<compile_context>
chip_gen: v5e
topology: v5e:2x2
jax: 0.10.0
libtpu: 0.0.40
codegen_flags: <defaults>
</compile_context>

<pallas_src>
import math

import jax
import jax.numpy as jnp
from jax.experimental import pallas as pl
from jax.experimental.pallas import tpu as pltpu

# ---- model hyperparameters (small instantiation of SimpleTransformer) -------
VOCAB = 100
VOCAB_PAD = 128                 # one lane tile; rows [100,128) of the table are zero
D_MODEL = 32
NUM_HEADS = 4
NUM_LAYERS = 2
D_FF = 64
NUM_CLASSES = 2
MAX_LEN = 64
D_K = D_MODEL // NUM_HEADS
EPS = 1e-5                      # nn.LayerNorm default

# ---- packed parameter layout -------------------------------------------------
QKV_COLS = 3 * D_MODEL          # 96: [Wq | Wk | Wv] columns
QKV_TILE = 128                  # lane-tile-aligned QKV block (cols 96..127 zero)
W_IN_COLS = QKV_TILE + D_FF     # 192: [Wqkv(+pad) | W1]
W_OUT_ROWS = D_MODEL + D_FF     # 96:  [Wo ; W2]
VEC_ROWS = 8                    # bqkv, bo, b1, b2, g1, be1, g2, be2
VEC_COLS = QKV_TILE             # 128 (bqkv is full-width, padded with zeros)
HP_ROWS = D_MODEL + 3           # [Wc(padded) ; final gamma ; final beta ; bc]


def _layer_norm(x, gamma, beta):
    mean = jnp.mean(x, axis=-1, keepdims=True)
    var = jnp.mean((x - mean) ** 2, axis=-1, keepdims=True)
    return (x - mean) * jax.lax.rsqrt(var + EPS) * gamma + beta


# --------------------------- fused Pallas kernel ------------------------------
def _make_kernel(b_blk, seq):
    n = b_blk * seq
    scale = 1.0 / math.sqrt(D_K)
    sqrt_d = math.sqrt(D_MODEL)
    bf16 = jnp.bfloat16

    def kernel(src_ref, tbl_ref, w_in_ref, w_out_ref, vec_ref, hp_ref, o_ref):
        # ---- fused embedding gather (one-hot matmul) + scale + pos-encoding ----
        ids = src_ref[...]                                              # (n, 1) int32
        onehot = (ids == jax.lax.broadcasted_iota(jnp.int32, (n, VOCAB_PAD), 1)
                  ).astype(jnp.float32)                                 # (n, 128)
        emb = tbl_ref[0:VOCAB_PAD, :]                                   # (128, D) f32
        pe = tbl_ref[VOCAB_PAD:VOCAB_PAD + seq, :]                      # (S, D)   f32
        x = jnp.dot(onehot, emb, preferred_element_type=jnp.float32) * sqrt_d
        x = (x.reshape(b_blk, seq, D_MODEL) + pe[None, :, :]).reshape(n, D_MODEL)

        for l in range(NUM_LAYERS):                 # static unroll over layers
            w_in = w_in_ref[l]                      # (D, 192)  bf16
            w_out = w_out_ref[l]                    # (96, D)   bf16
            vec = vec_ref[l]                        # (8, 128)  f32

            wqkv = w_in[:, :QKV_TILE]               # lane-tile aligned (cols 96..127 zero)
            w1 = w_in[:, QKV_TILE:]                 # (D, D_FF)
            wo = w_out[:D_MODEL, :]                 # (D, D)
            w2 = w_out[D_MODEL:, :]                 # (D_FF, D)

            bqkv = vec[0:1, :]                      # (1, 128), zero-padded
            bo = vec[1:2, :D_MODEL]
            b1 = vec[2:3, :D_FF]
            b2 = vec[3:4, :D_MODEL]
            g1 = vec[4:5, :D_MODEL]
            be1 = vec[5:6, :D_MODEL]
            g2 = vec[6:7, :D_MODEL]
            be2 = vec[7:8, :D_MODEL]

            # ---- fused QKV projection: one (n,D)@(D,128) matmul ----
            qkv = jnp.dot(x.astype(bf16), wqkv,
                          preferred_element_type=jnp.float32) + bqkv    # (n, 128)
            qkv3 = qkv.reshape(b_blk, seq, QKV_TILE)

            # ---- head-batched attention: heads folded into the batch dim so the
            #      score matmul, ONE softmax chain and P@V are single batched ops.
            def head_slice(base, h):
                off = base + h * D_K
                return qkv3[:, :, off:off + D_K]                        # (b, S, DK)

            q = jnp.concatenate([head_slice(0, h) for h in range(NUM_HEADS)],
                                axis=0).astype(bf16)                    # (H*b, S, DK)
            k = jnp.concatenate([head_slice(D_MODEL, h) for h in range(NUM_HEADS)],
                                axis=0).astype(bf16)
            v = jnp.concatenate([head_slice(2 * D_MODEL, h) for h in range(NUM_HEADS)],
                                axis=0).astype(bf16)

            s = jnp.einsum('bqd,bkd->bqk', q, k,
                           preferred_element_type=jnp.float32) * scale  # (H*b, S, S)
            s = s - jnp.max(s, axis=-1, keepdims=True)
            p = jnp.exp(s)
            p = p * pl.reciprocal(jnp.sum(p, axis=-1, keepdims=True), approx=True)
            oh = jnp.einsum('bqk,bkd->bqd', p.astype(bf16), v,
                            preferred_element_type=jnp.float32)         # (H*b, S, DK)

            # merge heads back to lanes -> single W_o matmul (no per-head acc)
            ocat = jnp.concatenate(
                [oh[h * b_blk:(h + 1) * b_blk] for h in range(NUM_HEADS)],
                axis=-1).reshape(n, D_MODEL)
            attn = jnp.dot(ocat.astype(bf16), wo,
                           preferred_element_type=jnp.float32) + bo
            # TODO(synk): dropout layers are identity (eval-mode semantics) and the
            #             optional attention mask is not supported.

            # ---- Add & Norm 1 ----
            x1 = _layer_norm(x + attn, g1, be1)

            # ---- position-wise feed-forward ----
            h1 = jnp.dot(x1.astype(bf16), w1, preferred_element_type=jnp.float32) + b1
            h1 = jnp.maximum(h1, 0.0)
            ff = jnp.dot(h1.astype(bf16), w2, preferred_element_type=jnp.float32) + b2

            # ---- Add & Norm 2 ----
            x = _layer_norm(x1 + ff, g2, be2)

        # ---- final encoder LayerNorm + classifier on the CLS token ----
        if b_blk == 1:
            cls = x[0:1, :]                                             # single CLS row
        else:
            cls = x.reshape(b_blk, seq, D_MODEL)[:, 0, :]               # strided extraction
        hp = hp_ref[...]                                                # (D+3, D) f32
        cls_n = _layer_norm(cls, hp[D_MODEL:D_MODEL + 1, :],
                            hp[D_MODEL + 1:D_MODEL + 2, :])
        logits = (jnp.dot(cls_n.astype(bf16), hp[:D_MODEL, :].astype(bf16),
                          preferred_element_type=jnp.float32)
                  + hp[D_MODEL + 2:D_MODEL + 3, :])                     # (b_blk, D) padded
        o_ref[...] = logits[:, :NUM_CLASSES].reshape(1, b_blk, NUM_CLASSES)

    return kernel


# --------------------------- glue / parameters --------------------------------
def positional_encoding(seq_len, d_model):
    pos = jnp.arange(seq_len, dtype=jnp.float32)[:, None]
    div = jnp.exp(jnp.arange(0, d_model, 2, dtype=jnp.float32)
                  * (-math.log(10000.0) / d_model))
    pe = jnp.zeros((seq_len, d_model), jnp.float32)
    pe = pe.at[:, 0::2].set(jnp.sin(pos * div))
    pe = pe.at[:, 1::2].set(jnp.cos(pos * div))
    return pe  # (S, D)


def init_params(key):
    def nrm(k, shape, scale=0.02):
        return scale * jax.random.normal(k, shape, jnp.float32)

    keys = iter(jax.random.split(key, 6 * NUM_LAYERS + 2))

    # embedding table + positional encoding packed into one lane/sublane-aligned table
    emb = nrm(next(keys), (VOCAB, D_MODEL), 1.0)
    emb_pe = jnp.zeros((VOCAB_PAD + MAX_LEN, D_MODEL), jnp.float32)
    emb_pe = emb_pe.at[:VOCAB].set(emb)
    emb_pe = emb_pe.at[VOCAB_PAD:].set(positional_encoding(MAX_LEN, D_MODEL))

    w_in_all, w_out_all, vec_all = [], [], []
    for _ in range(NUM_LAYERS):
        wq = nrm(next(keys), (D_MODEL, D_MODEL))
        wk = nrm(next(keys), (D_MODEL, D_MODEL))
        wv = nrm(next(keys), (D_MODEL, D_MODEL))
        wo = nrm(next(keys), (D_MODEL, D_MODEL))
        w1 = nrm(next(keys), (D_MODEL, D_FF))
        w2 = nrm(next(keys), (D_FF, D_MODEL))

        w_in = jnp.zeros((D_MODEL, W_IN_COLS), jnp.float32)
        w_in = w_in.at[:, :QKV_COLS].set(jnp.concatenate([wq, wk, wv], axis=1))
        w_in = w_in.at[:, QKV_TILE:QKV_TILE + D_FF].set(w1)
        w_out = jnp.concatenate([wo, w2], axis=0)                  # (D+D_FF, D)

        vec = jnp.zeros((VEC_ROWS, VEC_COLS), jnp.float32)         # biases zero
        vec = vec.at[4, :D_MODEL].set(1.0)                         # LN1 gamma
        vec = vec.at[6, :D_MODEL].set(1.0)                         # LN2 gamma

        w_in_all.append(w_in)
        w_out_all.append(w_out)
        vec_all.append(vec)

    wc = nrm(next(keys), (D_MODEL, NUM_CLASSES))
    head_pack = jnp.zeros((HP_ROWS, D_MODEL), jnp.float32)
    head_pack = head_pack.at[:D_MODEL, :NUM_CLASSES].set(wc)       # classifier W (padded)
    head_pack = head_pack.at[D_MODEL, :].set(1.0)                  # final LN gamma
    # rows D_MODEL+1 (final LN beta) and D_MODEL+2 (classifier bias) stay zero

    return {
        "emb_pe": emb_pe,                                          # f32 (192, 32)
        "w_in": jnp.stack(w_in_all).astype(jnp.bfloat16),          # (L, 32, 192) bf16
        "w_out": jnp.stack(w_out_all).astype(jnp.bfloat16),        # (L, 96, 32)  bf16
        "vecs": jnp.stack(vec_all),                                # (L, 8, 128)  f32
        "head_pack": head_pack,                                    # (35, 32)     f32
    }


@jax.jit
def simple_transformer_forward(src, params):
    """src: (B, S) int32 token ids -> (B, NUM_CLASSES) logits."""
    B, S = src.shape
    # 2-way batch-parallel grid so v7x's two TensorCores each take half the batch.
    n_blocks = 2 if (B >= 2 and B % 2 == 0) else 1
    b_blk = B // n_blocks
    ids = src.astype(jnp.int32).reshape(B * S, 1)

    kernel = _make_kernel(b_blk, S)
    out = pl.pallas_call(
        kernel,
        grid=(n_blocks,),
        in_specs=[
            pl.BlockSpec((b_blk * S, 1), lambda i: (i, 0)),                       # token ids
            pl.BlockSpec((VOCAB_PAD + MAX_LEN, D_MODEL), lambda i: (0, 0)),       # emb + PE
            pl.BlockSpec((NUM_LAYERS, D_MODEL, W_IN_COLS), lambda i: (0, 0, 0)),  # Wqkv|W1
            pl.BlockSpec((NUM_LAYERS, W_OUT_ROWS, D_MODEL), lambda i: (0, 0, 0)), # Wo;W2
            pl.BlockSpec((NUM_LAYERS, VEC_ROWS, VEC_COLS), lambda i: (0, 0, 0)),  # biases/LN
            pl.BlockSpec((HP_ROWS, D_MODEL), lambda i: (0, 0)),                   # head pack
        ],
        out_specs=pl.BlockSpec((1, b_blk, NUM_CLASSES), lambda i: (i, 0, 0)),
        out_shape=jax.ShapeDtypeStruct((n_blocks, b_blk, NUM_CLASSES), jnp.float32),
        compiler_params=pltpu.CompilerParams(
            dimension_semantics=("parallel",)),
    )(ids, params["emb_pe"], params["w_in"], params["w_out"],
      params["vecs"], params["head_pack"])
    return out.reshape(B, NUM_CLASSES)


if __name__ == "__main__":
    key = jax.random.PRNGKey(0)
    pkey, dkey = jax.random.split(key)
    params = init_params(pkey)

    B, S = 2, 8
    src = jax.random.randint(dkey, (B, S), 0, VOCAB, dtype=jnp.int32)

    logits = simple_transformer_forward(src, params)
    jax.block_until_ready(logits)
    assert logits.shape == (B, NUM_CLASSES)
    assert bool(jnp.all(jnp.isfinite(logits)))
    print("KERNEL_OK")
</pallas_src>

<mosaic_0001>
module attributes {stable_mosaic.version = 11 : i64} {
  func.func @kernel(%arg0: i32, %arg1: memref<8x1xi32, #tpu.memory_space<vmem>>, %arg2: memref<192x32xf32, #tpu.memory_space<vmem>>, %arg3: memref<2x32x192xbf16, #tpu.memory_space<vmem>>, %arg4: memref<2x96x32xbf16, #tpu.memory_space<vmem>>, %arg5: memref<2x8x128xf32, #tpu.memory_space<vmem>>, %arg6: memref<35x32xf32, #tpu.memory_space<vmem>>, %arg7: memref<1x1x2xf32, #tpu.memory_space<vmem>>) attributes {dimension_semantics = [#tpu.dimension_semantics<parallel>], iteration_bounds = array<i64: 2>, scalar_prefetch = 0 : i64, scratch_operands = 0 : i64, tpu.core_type = #tpu.core_type<tc>, window_params = [{transform_indices = @transform_0, window_bounds = array<i64: 8, 1>}, {pipeline_mode = #tpu.pipeline_mode<synchronous>, transform_indices = @transform_1, window_bounds = array<i64: 192, 32>}, {pipeline_mode = #tpu.pipeline_mode<synchronous>, transform_indices = @transform_2, window_bounds = array<i64: 2, 32, 192>}, {pipeline_mode = #tpu.pipeline_mode<synchronous>, transform_indices = @transform_3, window_bounds = array<i64: 2, 96, 32>}, {pipeline_mode = #tpu.pipeline_mode<synchronous>, transform_indices = @transform_4, window_bounds = array<i64: 2, 8, 128>}, {pipeline_mode = #tpu.pipeline_mode<synchronous>, transform_indices = @transform_5, window_bounds = array<i64: 35, 32>}, {transform_indices = @transform_6, window_bounds = array<i64: 1, 1, 2>}]} {
    %c0 = arith.constant 0 : index
    %c0_0 = arith.constant 0 : index
    %0 = vector.load %arg1[%c0, %c0_0] : memref<8x1xi32, #tpu.memory_space<vmem>>, vector<8x1xi32>
    %1 = tpu.iota {dimensions = array<i32: 1>} : vector<8x128xi32>
    %2 = vector.broadcast %0 : vector<8x1xi32> to vector<8x128xi32>
    %3 = arith.cmpi eq, %2, %1 : vector<8x128xi32>
    %4 = arith.extui %3 : vector<8x128xi1> to vector<8x128xi32>
    %5 = arith.sitofp %4 : vector<8x128xi32> to vector<8x128xf32>
    %c0_1 = arith.constant 0 : index
    %c0_2 = arith.constant 0 : index
    %6 = vector.load %arg2[%c0_1, %c0_2] : memref<192x32xf32, #tpu.memory_space<vmem>>, vector<128x32xf32>
    %c128 = arith.constant 128 : index
    %c0_3 = arith.constant 0 : index
    %7 = vector.load %arg2[%c128, %c0_3] : memref<192x32xf32, #tpu.memory_space<vmem>>, vector<8x32xf32>
    %cst = arith.constant dense<0.000000e+00> : vector<8x32xf32>
    %8 = tpu.matmul %5, %6, %cst {dimension_numbers = #tpu.dot_dimension_numbers<[1], [0], [0], [1], [0, 0, 1, 1], [], []>} : vector<8x128xf32>, vector<128x32xf32>, vector<8x32xf32> -> vector<8x32xf32>
    %cst_4 = arith.constant 5.65685415 : f32
    %9 = vector.broadcast %cst_4 : f32 to vector<8x32xf32>
    %10 = arith.mulf %8, %9 : vector<8x32xf32>
    %11 = vector.shape_cast %10 : vector<8x32xf32> to vector<1x8x32xf32>
    %12 = vector.shape_cast %7 : vector<8x32xf32> to vector<1x8x32xf32>
    %13 = arith.addf %11, %12 : vector<1x8x32xf32>
    %14 = vector.shape_cast %13 : vector<1x8x32xf32> to vector<8x32xf32>
    %c0_5 = arith.constant 0 : index
    %c0_6 = arith.constant 0 : index
    %c0_7 = arith.constant 0 : index
    %15 = vector.load %arg3[%c0_5, %c0_6, %c0_7] : memref<2x32x192xbf16, #tpu.memory_space<vmem>>, vector<1x32x192xbf16>
    %16 = vector.shape_cast %15 : vector<1x32x192xbf16> to vector<32x192xbf16>
    %c0_8 = arith.constant 0 : index
    %c0_9 = arith.constant 0 : index
    %c0_10 = arith.constant 0 : index
    %17 = vector.load %arg4[%c0_8, %c0_9, %c0_10] : memref<2x96x32xbf16, #tpu.memory_space<vmem>>, vector<1x96x32xbf16>
    %18 = vector.shape_cast %17 : vector<1x96x32xbf16> to vector<96x32xbf16>
    %c0_11 = arith.constant 0 : index
    %c0_12 = arith.constant 0 : index
    %c0_13 = arith.constant 0 : index
    %19 = vector.load %arg5[%c0_11, %c0_12, %c0_13] : memref<2x8x128xf32, #tpu.memory_space<vmem>>, vector<1x8x128xf32>
    %20 = vector.shape_cast %19 : vector<1x8x128xf32> to vector<8x128xf32>
    %21 = vector.extract_strided_slice %16 {offsets = [0, 0], sizes = [32, 128], strides = [1, 1]} : vector<32x192xbf16> to vector<32x128xbf16>
    %22 = vector.extract_strided_slice %16 {offsets = [0, 128], sizes = [32, 64], strides = [1, 1]} : vector<32x192xbf16> to vector<32x64xbf16>
    %23 = vector.extract_strided_slice %18 {offsets = [0, 0], sizes = [32, 32], strides = [1, 1]} : vector<96x32xbf16> to vector<32x32xbf16>
    %24 = vector.extract_strided_slice %18 {offsets = [32, 0], sizes = [64, 32], strides = [1, 1]} : vector<96x32xbf16> to vector<64x32xbf16>
    %25 = vector.extract_strided_slice %20 {offsets = [0, 0], sizes = [1, 128], strides = [1, 1]} : vector<8x128xf32> to vector<1x128xf32>
    %26 = vector.extract_strided_slice %20 {offsets = [1, 0], sizes = [1, 32], strides = [1, 1]} : vector<8x128xf32> to vector<1x32xf32>
    %27 = vector.extract_strided_slice %20 {offsets = [2, 0], sizes = [1, 64], strides = [1, 1]} : vector<8x128xf32> to vector<1x64xf32>
    %28 = vector.extract_strided_slice %20 {offsets = [3, 0], sizes = [1, 32], strides = [1, 1]} : vector<8x128xf32> to vector<1x32xf32>
    %29 = vector.extract_strided_slice %20 {offsets = [4, 0], sizes = [1, 32], strides = [1, 1]} : vector<8x128xf32> to vector<1x32xf32>
    %30 = vector.extract_strided_slice %20 {offsets = [5, 0], sizes = [1, 32], strides = [1, 1]} : vector<8x128xf32> to vector<1x32xf32>
    %31 = vector.extract_strided_slice %20 {offsets = [6, 0], sizes = [1, 32], strides = [1, 1]} : vector<8x128xf32> to vector<1x32xf32>
    %32 = vector.extract_strided_slice %20 {offsets = [7, 0], sizes = [1, 32], strides = [1, 1]} : vector<8x128xf32> to vector<1x32xf32>
    %33 = arith.truncf %14 : vector<8x32xf32> to vector<8x32xbf16>
    %cst_14 = arith.constant dense<0.000000e+00> : vector<8x128xf32>
    %34 = tpu.matmul %33, %21, %cst_14 {dimension_numbers = #tpu.dot_dimension_numbers<[1], [0], [0], [1], [0, 0, 1, 1], [], []>} : vector<8x32xbf16>, vector<32x128xbf16>, vector<8x128xf32> -> vector<8x128xf32>
    %35 = vector.broadcast %25 : vector<1x128xf32> to vector<8x128xf32>
    %36 = arith.addf %34, %35 : vector<8x128xf32>
    %37 = vector.shape_cast %36 : vector<8x128xf32> to vector<1x8x128xf32>
    %38 = vector.extract_strided_slice %37 {offsets = [0, 0, 0], sizes = [1, 8, 8], strides = [1, 1, 1]} : vector<1x8x128xf32> to vector<1x8x8xf32>
    %39 = vector.extract_strided_slice %37 {offsets = [0, 0, 8], sizes = [1, 8, 8], strides = [1, 1, 1]} : vector<1x8x128xf32> to vector<1x8x8xf32>
    %40 = vector.extract_strided_slice %37 {offsets = [0, 0, 16], sizes = [1, 8, 8], strides = [1, 1, 1]} : vector<1x8x128xf32> to vector<1x8x8xf32>
    %41 = vector.extract_strided_slice %37 {offsets = [0, 0, 24], sizes = [1, 8, 8], strides = [1, 1, 1]} : vector<1x8x128xf32> to vector<1x8x8xf32>
    %42 = tpu.concatenate %38, %39, %40, %41 in 0 : vector<1x8x8xf32>, vector<1x8x8xf32>, vector<1x8x8xf32>, vector<1x8x8xf32> -> vector<4x8x8xf32>
    %43 = arith.truncf %42 : vector<4x8x8xf32> to vector<4x8x8xbf16>
    %44 = vector.extract_strided_slice %37 {offsets = [0, 0, 32], sizes = [1, 8, 8], strides = [1, 1, 1]} : vector<1x8x128xf32> to vector<1x8x8xf32>
    %45 = vector.extract_strided_slice %37 {offsets = [0, 0, 40], sizes = [1, 8, 8], strides = [1, 1, 1]} : vector<1x8x128xf32> to vector<1x8x8xf32>
    %46 = vector.extract_strided_slice %37 {offsets = [0, 0, 48], sizes = [1, 8, 8], strides = [1, 1, 1]} : vector<1x8x128xf32> to vector<1x8x8xf32>
    %47 = vector.extract_strided_slice %37 {offsets = [0, 0, 56], sizes = [1, 8, 8], strides = [1, 1, 1]} : vector<1x8x128xf32> to vector<1x8x8xf32>
    %48 = tpu.concatenate %44, %45, %46, %47 in 0 : vector<1x8x8xf32>, vector<1x8x8xf32>, vector<1x8x8xf32>, vector<1x8x8xf32> -> vector<4x8x8xf32>
    %49 = arith.truncf %48 : vector<4x8x8xf32> to vector<4x8x8xbf16>
    %50 = vector.extract_strided_slice %37 {offsets = [0, 0, 64], sizes = [1, 8, 8], strides = [1, 1, 1]} : vector<1x8x128xf32> to vector<1x8x8xf32>
    %51 = vector.extract_strided_slice %37 {offsets = [0, 0, 72], sizes = [1, 8, 8], strides = [1, 1, 1]} : vector<1x8x128xf32> to vector<1x8x8xf32>
    %52 = vector.extract_strided_slice %37 {offsets = [0, 0, 80], sizes = [1, 8, 8], strides = [1, 1, 1]} : vector<1x8x128xf32> to vector<1x8x8xf32>
    %53 = vector.extract_strided_slice %37 {offsets = [0, 0, 88], sizes = [1, 8, 8], strides = [1, 1, 1]} : vector<1x8x128xf32> to vector<1x8x8xf32>
    %54 = tpu.concatenate %50, %51, %52, %53 in 0 : vector<1x8x8xf32>, vector<1x8x8xf32>, vector<1x8x8xf32>, vector<1x8x8xf32> -> vector<4x8x8xf32>
    %55 = arith.truncf %54 : vector<4x8x8xf32> to vector<4x8x8xbf16>
    "tpu.trace_start"() <{level = 10 : i32, message = "bqd,bkd->bqk"}> : () -> ()
    %cst_15 = arith.constant dense<0.000000e+00> : vector<4x8x8xf32>
    %56 = tpu.matmul %43, %49, %cst_15 {dimension_numbers = #tpu.dot_dimension_numbers<[2], [2], [1], [1], [0, 0, 0, 1, 1, 1], [0], [0]>} : vector<4x8x8xbf16>, vector<4x8x8xbf16>, vector<4x8x8xf32> -> vector<4x8x8xf32>
    "tpu.trace_stop"() : () -> ()
    %cst_16 = arith.constant 0.353553385 : f32
    %57 = vector.broadcast %cst_16 : f32 to vector<4x8x8xf32>
    %58 = arith.mulf %56, %57 : vector<4x8x8xf32>
    %cst_17 = arith.constant dense<0xFF800000> : vector<4x8xf32>
    %59 = vector.multi_reduction <maximumf>, %58, %cst_17 [2] : vector<4x8x8xf32> to vector<4x8xf32>
    %60 = vector.shape_cast %59 : vector<4x8xf32> to vector<4x8x1xf32>
    %61 = vector.broadcast %60 : vector<4x8x1xf32> to vector<4x8x8xf32>
    %62 = arith.subf %58, %61 : vector<4x8x8xf32>
    %63 = math.exp %62 : vector<4x8x8xf32>
    %cst_18 = arith.constant dense<0.000000e+00> : vector<4x8xf32>
    %64 = vector.multi_reduction <add>, %63, %cst_18 [2] : vector<4x8x8xf32> to vector<4x8xf32>
    %65 = vector.shape_cast %64 : vector<4x8xf32> to vector<4x8x1xf32>
    %66 = tpu.reciprocal %65 {approx = true} : vector<4x8x1xf32> -> vector<4x8x1xf32>
    %67 = vector.broadcast %66 : vector<4x8x1xf32> to vector<4x8x8xf32>
    %68 = arith.mulf %63, %67 : vector<4x8x8xf32>
    %69 = arith.truncf %68 : vector<4x8x8xf32> to vector<4x8x8xbf16>
    "tpu.trace_start"() <{level = 10 : i32, message = "bqk,bkd->bqd"}> : () -> ()
    %cst_19 = arith.constant dense<0.000000e+00> : vector<4x8x8xf32>
    %70 = tpu.matmul %69, %55, %cst_19 {dimension_numbers = #tpu.dot_dimension_numbers<[2], [1], [1], [2], [0, 0, 0, 1, 1, 2], [0], [0]>} : vector<4x8x8xbf16>, vector<4x8x8xbf16>, vector<4x8x8xf32> -> vector<4x8x8xf32>
    "tpu.trace_stop"() : () -> ()
    %71 = vector.extract_strided_slice %70 {offsets = [0, 0, 0], sizes = [1, 8, 8], strides = [1, 1, 1]} : vector<4x8x8xf32> to vector<1x8x8xf32>
    %72 = vector.extract_strided_slice %70 {offsets = [1, 0, 0], sizes = [1, 8, 8], strides = [1, 1, 1]} : vector<4x8x8xf32> to vector<1x8x8xf32>
    %73 = vector.extract_strided_slice %70 {offsets = [2, 0, 0], sizes = [1, 8, 8], strides = [1, 1, 1]} : vector<4x8x8xf32> to vector<1x8x8xf32>
    %74 = vector.extract_strided_slice %70 {offsets = [3, 0, 0], sizes = [1, 8, 8], strides = [1, 1, 1]} : vector<4x8x8xf32> to vector<1x8x8xf32>
    %75 = tpu.concatenate %71, %72, %73, %74 in 2 : vector<1x8x8xf32>, vector<1x8x8xf32>, vector<1x8x8xf32>, vector<1x8x8xf32> -> vector<1x8x32xf32>
    %76 = vector.shape_cast %75 : vector<1x8x32xf32> to vector<8x32xf32>
    %77 = arith.truncf %76 : vector<8x32xf32> to vector<8x32xbf16>
    %cst_20 = arith.constant dense<0.000000e+00> : vector<8x32xf32>
    %78 = tpu.matmul %77, %23, %cst_20 {dimension_numbers = #tpu.dot_dimension_numbers<[1], [0], [0], [1], [0, 0, 1, 1], [], []>} : vector<8x32xbf16>, vector<32x32xbf16>, vector<8x32xf32> -> vector<8x32xf32>
    %79 = vector.broadcast %26 : vector<1x32xf32> to vector<8x32xf32>
    %80 = arith.addf %78, %79 : vector<8x32xf32>
    %81 = arith.addf %14, %80 : vector<8x32xf32>
    %cst_21 = arith.constant dense<0.000000e+00> : vector<8xf32>
    %82 = vector.multi_reduction <add>, %81, %cst_21 [1] : vector<8x32xf32> to vector<8xf32>
    %83 = vector.shape_cast %82 : vector<8xf32> to vector<8x1xf32>
    %cst_22 = arith.constant 3.200000e+01 : f32
    %84 = vector.broadcast %cst_22 : f32 to vector<8x1xf32>
    %85 = arith.divf %83, %84 : vector<8x1xf32>
    %86 = vector.broadcast %85 : vector<8x1xf32> to vector<8x32xf32>
    %87 = arith.subf %81, %86 : vector<8x32xf32>
    %88 = arith.mulf %87, %87 : vector<8x32xf32>
    %cst_23 = arith.constant dense<0.000000e+00> : vector<8xf32>
    %89 = vector.multi_reduction <add>, %88, %cst_23 [1] : vector<8x32xf32> to vector<8xf32>
    %90 = vector.shape_cast %89 : vector<8xf32> to vector<8x1xf32>
    %cst_24 = arith.constant 3.200000e+01 : f32
    %91 = vector.broadcast %cst_24 : f32 to vector<8x1xf32>
    %92 = arith.divf %90, %91 : vector<8x1xf32>
    %93 = vector.broadcast %85 : vector<8x1xf32> to vector<8x32xf32>
    %94 = arith.subf %81, %93 : vector<8x32xf32>
    %cst_25 = arith.constant 9.99999974E-6 : f32
    %95 = vector.broadcast %cst_25 : f32 to vector<8x1xf32>
    %96 = arith.addf %92, %95 : vector<8x1xf32>
    %97 = math.rsqrt %96 : vector<8x1xf32>
    %98 = vector.broadcast %97 : vector<8x1xf32> to vector<8x32xf32>
    %99 = arith.mulf %94, %98 : vector<8x32xf32>
    %100 = vector.broadcast %29 : vector<1x32xf32> to vector<8x32xf32>
    %101 = arith.mulf %99, %100 : vector<8x32xf32>
    %102 = vector.broadcast %30 : vector<1x32xf32> to vector<8x32xf32>
    %103 = arith.addf %101, %102 : vector<8x32xf32>
    %104 = arith.truncf %103 : vector<8x32xf32> to vector<8x32xbf16>
    %cst_26 = arith.constant dense<0.000000e+00> : vector<8x64xf32>
    %105 = tpu.matmul %104, %22, %cst_26 {dimension_numbers = #tpu.dot_dimension_numbers<[1], [0], [0], [1], [0, 0, 1, 1], [], []>} : vector<8x32xbf16>, vector<32x64xbf16>, vector<8x64xf32> -> vector<8x64xf32>
    %106 = vector.broadcast %27 : vector<1x64xf32> to vector<8x64xf32>
    %107 = arith.addf %105, %106 : vector<8x64xf32>
    %cst_27 = arith.constant 0.000000e+00 : f32
    %108 = vector.broadcast %cst_27 : f32 to vector<8x64xf32>
    %109 = arith.maximumf %107, %108 : vector<8x64xf32>
    %110 = arith.truncf %109 : vector<8x64xf32> to vector<8x64xbf16>
    %cst_28 = arith.constant dense<0.000000e+00> : vector<8x32xf32>
    %111 = tpu.matmul %110, %24, %cst_28 {dimension_numbers = #tpu.dot_dimension_numbers<[1], [0], [0], [1], [0, 0, 1, 1], [], []>} : vector<8x64xbf16>, vector<64x32xbf16>, vector<8x32xf32> -> vector<8x32xf32>
    %112 = vector.broadcast %28 : vector<1x32xf32> to vector<8x32xf32>
    %113 = arith.addf %111, %112 : vector<8x32xf32>
    %114 = arith.addf %103, %113 : vector<8x32xf32>
    %cst_29 = arith.constant dense<0.000000e+00> : vector<8xf32>
    %115 = vector.multi_reduction <add>, %114, %cst_29 [1] : vector<8x32xf32> to vector<8xf32>
    %116 = vector.shape_cast %115 : vector<8xf32> to vector<8x1xf32>
    %cst_30 = arith.constant 3.200000e+01 : f32
    %117 = vector.broadcast %cst_30 : f32 to vector<8x1xf32>
    %118 = arith.divf %116, %117 : vector<8x1xf32>
    %119 = vector.broadcast %118 : vector<8x1xf32> to vector<8x32xf32>
    %120 = arith.subf %114, %119 : vector<8x32xf32>
    %121 = arith.mulf %120, %120 : vector<8x32xf32>
    %cst_31 = arith.constant dense<0.000000e+00> : vector<8xf32>
    %122 = vector.multi_reduction <add>, %121, %cst_31 [1] : vector<8x32xf32> to vector<8xf32>
    %123 = vector.shape_cast %122 : vector<8xf32> to vector<8x1xf32>
    %cst_32 = arith.constant 3.200000e+01 : f32
    %124 = vector.broadcast %cst_32 : f32 to vector<8x1xf32>
    %125 = arith.divf %123, %124 : vector<8x1xf32>
    %126 = vector.broadcast %118 : vector<8x1xf32> to vector<8x32xf32>
    %127 = arith.subf %114, %126 : vector<8x32xf32>
    %cst_33 = arith.constant 9.99999974E-6 : f32
    %128 = vector.broadcast %cst_33 : f32 to vector<8x1xf32>
    %129 = arith.addf %125, %128 : vector<8x1xf32>
    %130 = math.rsqrt %129 : vector<8x1xf32>
    %131 = vector.broadcast %130 : vector<8x1xf32> to vector<8x32xf32>
    %132 = arith.mulf %127, %131 : vector<8x32xf32>
    %133 = vector.broadcast %31 : vector<1x32xf32> to vector<8x32xf32>
    %134 = arith.mulf %132, %133 : vector<8x32xf32>
    %135 = vector.broadcast %32 : vector<1x32xf32> to vector<8x32xf32>
    %136 = arith.addf %134, %135 : vector<8x32xf32>
    %c1 = arith.constant 1 : index
    %c0_34 = arith.constant 0 : index
    %c0_35 = arith.constant 0 : index
    %137 = vector.load %arg3[%c1, %c0_34, %c0_35] : memref<2x32x192xbf16, #tpu.memory_space<vmem>>, vector<1x32x192xbf16>
    %138 = vector.shape_cast %137 : vector<1x32x192xbf16> to vector<32x192xbf16>
    %c1_36 = arith.constant 1 : index
    %c0_37 = arith.constant 0 : index
    %c0_38 = arith.constant 0 : index
    %139 = vector.load %arg4[%c1_36, %c0_37, %c0_38] : memref<2x96x32xbf16, #tpu.memory_space<vmem>>, vector<1x96x32xbf16>
    %140 = vector.shape_cast %139 : vector<1x96x32xbf16> to vector<96x32xbf16>
    %c1_39 = arith.constant 1 : index
    %c0_40 = arith.constant 0 : index
    %c0_41 = arith.constant 0 : index
    %141 = vector.load %arg5[%c1_39, %c0_40, %c0_41] : memref<2x8x128xf32, #tpu.memory_space<vmem>>, vector<1x8x128xf32>
    %142 = vector.shape_cast %141 : vector<1x8x128xf32> to vector<8x128xf32>
    %143 = vector.extract_strided_slice %138 {offsets = [0, 0], sizes = [32, 128], strides = [1, 1]} : vector<32x192xbf16> to vector<32x128xbf16>
    %144 = vector.extract_strided_slice %138 {offsets = [0, 128], sizes = [32, 64], strides = [1, 1]} : vector<32x192xbf16> to vector<32x64xbf16>
    %145 = vector.extract_strided_slice %140 {offsets = [0, 0], sizes = [32, 32], strides = [1, 1]} : vector<96x32xbf16> to vector<32x32xbf16>
    %146 = vector.extract_strided_slice %140 {offsets = [32, 0], sizes = [64, 32], strides = [1, 1]} : vector<96x32xbf16> to vector<64x32xbf16>
    %147 = vector.extract_strided_slice %142 {offsets = [0, 0], sizes = [1, 128], strides = [1, 1]} : vector<8x128xf32> to vector<1x128xf32>
    %148 = vector.extract_strided_slice %142 {offsets = [1, 0], sizes = [1, 32], strides = [1, 1]} : vector<8x128xf32> to vector<1x32xf32>
    %149 = vector.extract_strided_slice %142 {offsets = [2, 0], sizes = [1, 64], strides = [1, 1]} : vector<8x128xf32> to vector<1x64xf32>
    %150 = vector.extract_strided_slice %142 {offsets = [3, 0], sizes = [1, 32], strides = [1, 1]} : vector<8x128xf32> to vector<1x32xf32>
    %151 = vector.extract_strided_slice %142 {offsets = [4, 0], sizes = [1, 32], strides = [1, 1]} : vector<8x128xf32> to vector<1x32xf32>
    %152 = vector.extract_strided_slice %142 {offsets = [5, 0], sizes = [1, 32], strides = [1, 1]} : vector<8x128xf32> to vector<1x32xf32>
    %153 = vector.extract_strided_slice %142 {offsets = [6, 0], sizes = [1, 32], strides = [1, 1]} : vector<8x128xf32> to vector<1x32xf32>
    %154 = vector.extract_strided_slice %142 {offsets = [7, 0], sizes = [1, 32], strides = [1, 1]} : vector<8x128xf32> to vector<1x32xf32>
    %155 = arith.truncf %136 : vector<8x32xf32> to vector<8x32xbf16>
    %cst_42 = arith.constant dense<0.000000e+00> : vector<8x128xf32>
    %156 = tpu.matmul %155, %143, %cst_42 {dimension_numbers = #tpu.dot_dimension_numbers<[1], [0], [0], [1], [0, 0, 1, 1], [], []>} : vector<8x32xbf16>, vector<32x128xbf16>, vector<8x128xf32> -> vector<8x128xf32>
    %157 = vector.broadcast %147 : vector<1x128xf32> to vector<8x128xf32>
    %158 = arith.addf %156, %157 : vector<8x128xf32>
    %159 = vector.shape_cast %158 : vector<8x128xf32> to vector<1x8x128xf32>
    %160 = vector.extract_strided_slice %159 {offsets = [0, 0, 0], sizes = [1, 8, 8], strides = [1, 1, 1]} : vector<1x8x128xf32> to vector<1x8x8xf32>
    %161 = vector.extract_strided_slice %159 {offsets = [0, 0, 8], sizes = [1, 8, 8], strides = [1, 1, 1]} : vector<1x8x128xf32> to vector<1x8x8xf32>
    %162 = vector.extract_strided_slice %159 {offsets = [0, 0, 16], sizes = [1, 8, 8], strides = [1, 1, 1]} : vector<1x8x128xf32> to vector<1x8x8xf32>
    %163 = vector.extract_strided_slice %159 {offsets = [0, 0, 24], sizes = [1, 8, 8], strides = [1, 1, 1]} : vector<1x8x128xf32> to vector<1x8x8xf32>
    %164 = tpu.concatenate %160, %161, %162, %163 in 0 : vector<1x8x8xf32>, vector<1x8x8xf32>, vector<1x8x8xf32>, vector<1x8x8xf32> -> vector<4x8x8xf32>
    %165 = arith.truncf %164 : vector<4x8x8xf32> to vector<4x8x8xbf16>
    %166 = vector.extract_strided_slice %159 {offsets = [0, 0, 32], sizes = [1, 8, 8], strides = [1, 1, 1]} : vector<1x8x128xf32> to vector<1x8x8xf32>
    %167 = vector.extract_strided_slice %159 {offsets = [0, 0, 40], sizes = [1, 8, 8], strides = [1, 1, 1]} : vector<1x8x128xf32> to vector<1x8x8xf32>
    %168 = vector.extract_strided_slice %159 {offsets = [0, 0, 48], sizes = [1, 8, 8], strides = [1, 1, 1]} : vector<1x8x128xf32> to vector<1x8x8xf32>
    %169 = vector.extract_strided_slice %159 {offsets = [0, 0, 56], sizes = [1, 8, 8], strides = [1, 1, 1]} : vector<1x8x128xf32> to vector<1x8x8xf32>
    %170 = tpu.concatenate %166, %167, %168, %169 in 0 : vector<1x8x8xf32>, vector<1x8x8xf32>, vector<1x8x8xf32>, vector<1x8x8xf32> -> vector<4x8x8xf32>
    %171 = arith.truncf %170 : vector<4x8x8xf32> to vector<4x8x8xbf16>
    %172 = vector.extract_strided_slice %159 {offsets = [0, 0, 64], sizes = [1, 8, 8], strides = [1, 1, 1]} : vector<1x8x128xf32> to vector<1x8x8xf32>
    %173 = vector.extract_strided_slice %159 {offsets = [0, 0, 72], sizes = [1, 8, 8], strides = [1, 1, 1]} : vector<1x8x128xf32> to vector<1x8x8xf32>
    %174 = vector.extract_strided_slice %159 {offsets = [0, 0, 80], sizes = [1, 8, 8], strides = [1, 1, 1]} : vector<1x8x128xf32> to vector<1x8x8xf32>
    %175 = vector.extract_strided_slice %159 {offsets = [0, 0, 88], sizes = [1, 8, 8], strides = [1, 1, 1]} : vector<1x8x128xf32> to vector<1x8x8xf32>
    %176 = tpu.concatenate %172, %173, %174, %175 in 0 : vector<1x8x8xf32>, vector<1x8x8xf32>, vector<1x8x8xf32>, vector<1x8x8xf32> -> vector<4x8x8xf32>
    %177 = arith.truncf %176 : vector<4x8x8xf32> to vector<4x8x8xbf16>
    "tpu.trace_start"() <{level = 10 : i32, message = "bqd,bkd->bqk"}> : () -> ()
    %cst_43 = arith.constant dense<0.000000e+00> : vector<4x8x8xf32>
    %178 = tpu.matmul %165, %171, %cst_43 {dimension_numbers = #tpu.dot_dimension_numbers<[2], [2], [1], [1], [0, 0, 0, 1, 1, 1], [0], [0]>} : vector<4x8x8xbf16>, vector<4x8x8xbf16>, vector<4x8x8xf32> -> vector<4x8x8xf32>
    "tpu.trace_stop"() : () -> ()
    %cst_44 = arith.constant 0.353553385 : f32
    %179 = vector.broadcast %cst_44 : f32 to vector<4x8x8xf32>
    %180 = arith.mulf %178, %179 : vector<4x8x8xf32>
    %cst_45 = arith.constant dense<0xFF800000> : vector<4x8xf32>
    %181 = vector.multi_reduction <maximumf>, %180, %cst_45 [2] : vector<4x8x8xf32> to vector<4x8xf32>
    %182 = vector.shape_cast %181 : vector<4x8xf32> to vector<4x8x1xf32>
    %183 = vector.broadcast %182 : vector<4x8x1xf32> to vector<4x8x8xf32>
    %184 = arith.subf %180, %183 : vector<4x8x8xf32>
    %185 = math.exp %184 : vector<4x8x8xf32>
    %cst_46 = arith.constant dense<0.000000e+00> : vector<4x8xf32>
    %186 = vector.multi_reduction <add>, %185, %cst_46 [2] : vector<4x8x8xf32> to vector<4x8xf32>
    %187 = vector.shape_cast %186 : vector<4x8xf32> to vector<4x8x1xf32>
    %188 = tpu.reciprocal %187 {approx = true} : vector<4x8x1xf32> -> vector<4x8x1xf32>
    %189 = vector.broadcast %188 : vector<4x8x1xf32> to vector<4x8x8xf32>
    %190 = arith.mulf %185, %189 : vector<4x8x8xf32>
    %191 = arith.truncf %190 : vector<4x8x8xf32> to vector<4x8x8xbf16>
    "tpu.trace_start"() <{level = 10 : i32, message = "bqk,bkd->bqd"}> : () -> ()
    %cst_47 = arith.constant dense<0.000000e+00> : vector<4x8x8xf32>
    %192 = tpu.matmul %191, %177, %cst_47 {dimension_numbers = #tpu.dot_dimension_numbers<[2], [1], [1], [2], [0, 0, 0, 1, 1, 2], [0], [0]>} : vector<4x8x8xbf16>, vector<4x8x8xbf16>, vector<4x8x8xf32> -> vector<4x8x8xf32>
    "tpu.trace_stop"() : () -> ()
    %193 = vector.extract_strided_slice %192 {offsets = [0, 0, 0], sizes = [1, 8, 8], strides = [1, 1, 1]} : vector<4x8x8xf32> to vector<1x8x8xf32>
    %194 = vector.extract_strided_slice %192 {offsets = [1, 0, 0], sizes = [1, 8, 8], strides = [1, 1, 1]} : vector<4x8x8xf32> to vector<1x8x8xf32>
    %195 = vector.extract_strided_slice %192 {offsets = [2, 0, 0], sizes = [1, 8, 8], strides = [1, 1, 1]} : vector<4x8x8xf32> to vector<1x8x8xf32>
    %196 = vector.extract_strided_slice %192 {offsets = [3, 0, 0], sizes = [1, 8, 8], strides = [1, 1, 1]} : vector<4x8x8xf32> to vector<1x8x8xf32>
    %197 = tpu.concatenate %193, %194, %195, %196 in 2 : vector<1x8x8xf32>, vector<1x8x8xf32>, vector<1x8x8xf32>, vector<1x8x8xf32> -> vector<1x8x32xf32>
    %198 = vector.shape_cast %197 : vector<1x8x32xf32> to vector<8x32xf32>
    %199 = arith.truncf %198 : vector<8x32xf32> to vector<8x32xbf16>
    %cst_48 = arith.constant dense<0.000000e+00> : vector<8x32xf32>
    %200 = tpu.matmul %199, %145, %cst_48 {dimension_numbers = #tpu.dot_dimension_numbers<[1], [0], [0], [1], [0, 0, 1, 1], [], []>} : vector<8x32xbf16>, vector<32x32xbf16>, vector<8x32xf32> -> vector<8x32xf32>
    %201 = vector.broadcast %148 : vector<1x32xf32> to vector<8x32xf32>
    %202 = arith.addf %200, %201 : vector<8x32xf32>
    %203 = arith.addf %136, %202 : vector<8x32xf32>
    %cst_49 = arith.constant dense<0.000000e+00> : vector<8xf32>
    %204 = vector.multi_reduction <add>, %203, %cst_49 [1] : vector<8x32xf32> to vector<8xf32>
    %205 = vector.shape_cast %204 : vector<8xf32> to vector<8x1xf32>
    %cst_50 = arith.constant 3.200000e+01 : f32
    %206 = vector.broadcast %cst_50 : f32 to vector<8x1xf32>
    %207 = arith.divf %205, %206 : vector<8x1xf32>
    %208 = vector.broadcast %207 : vector<8x1xf32> to vector<8x32xf32>
    %209 = arith.subf %203, %208 : vector<8x32xf32>
    %210 = arith.mulf %209, %209 : vector<8x32xf32>
    %cst_51 = arith.constant dense<0.000000e+00> : vector<8xf32>
    %211 = vector.multi_reduction <add>, %210, %cst_51 [1] : vector<8x32xf32> to vector<8xf32>
    %212 = vector.shape_cast %211 : vector<8xf32> to vector<8x1xf32>
    %cst_52 = arith.constant 3.200000e+01 : f32
    %213 = vector.broadcast %cst_52 : f32 to vector<8x1xf32>
    %214 = arith.divf %212, %213 : vector<8x1xf32>
    %215 = vector.broadcast %207 : vector<8x1xf32> to vector<8x32xf32>
    %216 = arith.subf %203, %215 : vector<8x32xf32>
    %cst_53 = arith.constant 9.99999974E-6 : f32
    %217 = vector.broadcast %cst_53 : f32 to vector<8x1xf32>
    %218 = arith.addf %214, %217 : vector<8x1xf32>
    %219 = math.rsqrt %218 : vector<8x1xf32>
    %220 = vector.broadcast %219 : vector<8x1xf32> to vector<8x32xf32>
    %221 = arith.mulf %216, %220 : vector<8x32xf32>
    %222 = vector.broadcast %151 : vector<1x32xf32> to vector<8x32xf32>
    %223 = arith.mulf %221, %222 : vector<8x32xf32>
    %224 = vector.broadcast %152 : vector<1x32xf32> to vector<8x32xf32>
    %225 = arith.addf %223, %224 : vector<8x32xf32>
    %226 = arith.truncf %225 : vector<8x32xf32> to vector<8x32xbf16>
    %cst_54 = arith.constant dense<0.000000e+00> : vector<8x64xf32>
    %227 = tpu.matmul %226, %144, %cst_54 {dimension_numbers = #tpu.dot_dimension_numbers<[1], [0], [0], [1], [0, 0, 1, 1], [], []>} : vector<8x32xbf16>, vector<32x64xbf16>, vector<8x64xf32> -> vector<8x64xf32>
    %228 = vector.broadcast %149 : vector<1x64xf32> to vector<8x64xf32>
    %229 = arith.addf %227, %228 : vector<8x64xf32>
    %cst_55 = arith.constant 0.000000e+00 : f32
    %230 = vector.broadcast %cst_55 : f32 to vector<8x64xf32>
    %231 = arith.maximumf %229, %230 : vector<8x64xf32>
    %232 = arith.truncf %231 : vector<8x64xf32> to vector<8x64xbf16>
    %cst_56 = arith.constant dense<0.000000e+00> : vector<8x32xf32>
    %233 = tpu.matmul %232, %146, %cst_56 {dimension_numbers = #tpu.dot_dimension_numbers<[1], [0], [0], [1], [0, 0, 1, 1], [], []>} : vector<8x64xbf16>, vector<64x32xbf16>, vector<8x32xf32> -> vector<8x32xf32>
    %234 = vector.broadcast %150 : vector<1x32xf32> to vector<8x32xf32>
    %235 = arith.addf %233, %234 : vector<8x32xf32>
    %236 = arith.addf %225, %235 : vector<8x32xf32>
    %cst_57 = arith.constant dense<0.000000e+00> : vector<8xf32>
    %237 = vector.multi_reduction <add>, %236, %cst_57 [1] : vector<8x32xf32> to vector<8xf32>
    %238 = vector.shape_cast %237 : vector<8xf32> to vector<8x1xf32>
    %cst_58 = arith.constant 3.200000e+01 : f32
    %239 = vector.broadcast %cst_58 : f32 to vector<8x1xf32>
    %240 = arith.divf %238, %239 : vector<8x1xf32>
    %241 = vector.broadcast %240 : vector<8x1xf32> to vector<8x32xf32>
    %242 = arith.subf %236, %241 : vector<8x32xf32>
    %243 = arith.mulf %242, %242 : vector<8x32xf32>
    %cst_59 = arith.constant dense<0.000000e+00> : vector<8xf32>
    %244 = vector.multi_reduction <add>, %243, %cst_59 [1] : vector<8x32xf32> to vector<8xf32>
    %245 = vector.shape_cast %244 : vector<8xf32> to vector<8x1xf32>
    %cst_60 = arith.constant 3.200000e+01 : f32
    %246 = vector.broadcast %cst_60 : f32 to vector<8x1xf32>
    %247 = arith.divf %245, %246 : vector<8x1xf32>
    %248 = vector.broadcast %240 : vector<8x1xf32> to vector<8x32xf32>
    %249 = arith.subf %236, %248 : vector<8x32xf32>
    %cst_61 = arith.constant 9.99999974E-6 : f32
    %250 = vector.broadcast %cst_61 : f32 to vector<8x1xf32>
    %251 = arith.addf %247, %250 : vector<8x1xf32>
    %252 = math.rsqrt %251 : vector<8x1xf32>
    %253 = vector.broadcast %252 : vector<8x1xf32> to vector<8x32xf32>
    %254 = arith.mulf %249, %253 : vector<8x32xf32>
    %255 = vector.broadcast %153 : vector<1x32xf32> to vector<8x32xf32>
    %256 = arith.mulf %254, %255 : vector<8x32xf32>
    %257 = vector.broadcast %154 : vector<1x32xf32> to vector<8x32xf32>
    %258 = arith.addf %256, %257 : vector<8x32xf32>
    %259 = vector.extract_strided_slice %258 {offsets = [0, 0], sizes = [1, 32], strides = [1, 1]} : vector<8x32xf32> to vector<1x32xf32>
    %c0_62 = arith.constant 0 : index
    %c0_63 = arith.constant 0 : index
    %260 = vector.load %arg6[%c0_62, %c0_63] : memref<35x32xf32, #tpu.memory_space<vmem>>, vector<35x32xf32>
    %261 = vector.extract_strided_slice %260 {offsets = [32, 0], sizes = [1, 32], strides = [1, 1]} : vector<35x32xf32> to vector<1x32xf32>
    %262 = vector.extract_strided_slice %260 {offsets = [33, 0], sizes = [1, 32], strides = [1, 1]} : vector<35x32xf32> to vector<1x32xf32>
    %cst_64 = arith.constant dense<0.000000e+00> : vector<1xf32>
    %263 = vector.multi_reduction <add>, %259, %cst_64 [1] : vector<1x32xf32> to vector<1xf32>
    %264 = vector.shape_cast %263 : vector<1xf32> to vector<1x1xf32>
    %cst_65 = arith.constant 3.200000e+01 : f32
    %265 = vector.broadcast %cst_65 : f32 to vector<1x1xf32>
    %266 = arith.divf %264, %265 : vector<1x1xf32>
    %267 = vector.broadcast %266 : vector<1x1xf32> to vector<1x32xf32>
    %268 = arith.subf %259, %267 : vector<1x32xf32>
    %269 = arith.mulf %268, %268 : vector<1x32xf32>
    %cst_66 = arith.constant dense<0.000000e+00> : vector<1xf32>
    %270 = vector.multi_reduction <add>, %269, %cst_66 [1] : vector<1x32xf32> to vector<1xf32>
    %271 = vector.shape_cast %270 : vector<1xf32> to vector<1x1xf32>
    %cst_67 = arith.constant 3.200000e+01 : f32
    %272 = vector.broadcast %cst_67 : f32 to vector<1x1xf32>
    %273 = arith.divf %271, %272 : vector<1x1xf32>
    %274 = vector.broadcast %266 : vector<1x1xf32> to vector<1x32xf32>
    %275 = arith.subf %259, %274 : vector<1x32xf32>
    %cst_68 = arith.constant 9.99999974E-6 : f32
    %276 = vector.broadcast %cst_68 : f32 to vector<1x1xf32>
    %277 = arith.addf %273, %276 : vector<1x1xf32>
    %278 = math.rsqrt %277 : vector<1x1xf32>
    %279 = vector.broadcast %278 : vector<1x1xf32> to vector<1x32xf32>
    %280 = arith.mulf %275, %279 : vector<1x32xf32>
    %281 = arith.mulf %280, %261 : vector<1x32xf32>
    %282 = arith.addf %281, %262 : vector<1x32xf32>
    %283 = arith.truncf %282 : vector<1x32xf32> to vector<1x32xbf16>
    %284 = vector.extract_strided_slice %260 {offsets = [0, 0], sizes = [32, 32], strides = [1, 1]} : vector<35x32xf32> to vector<32x32xf32>
    %285 = arith.truncf %284 : vector<32x32xf32> to vector<32x32xbf16>
    %cst_69 = arith.constant dense<0.000000e+00> : vector<1x32xf32>
    %286 = tpu.matmul %283, %285, %cst_69 {dimension_numbers = #tpu.dot_dimension_numbers<[1], [0], [0], [1], [0, 0, 1, 1], [], []>} : vector<1x32xbf16>, vector<32x32xbf16>, vector<1x32xf32> -> vector<1x32xf32>
    %287 = vector.extract_strided_slice %260 {offsets = [34, 0], sizes = [1, 32], strides = [1, 1]} : vector<35x32xf32> to vector<1x32xf32>
    %288 = arith.addf %286, %287 : vector<1x32xf32>
    %289 = vector.extract_strided_slice %288 {offsets = [0, 0], sizes = [1, 2], strides = [1, 1]} : vector<1x32xf32> to vector<1x2xf32>
    %290 = vector.shape_cast %289 : vector<1x2xf32> to vector<1x1x2xf32>
    %c0_70 = arith.constant 0 : index
    %c0_71 = arith.constant 0 : index
    %c0_72 = arith.constant 0 : index
    %291 = vector.load %arg7[%c0_70, %c0_71, %c0_72] : memref<1x1x2xf32, #tpu.memory_space<vmem>>, vector<1x1x2xf32>
    tpu.vector_store %arg7[%c0_70, %c0_71, %c0_72], %290 {strides = array<i32>} : memref<1x1x2xf32, #tpu.memory_space<vmem>>, vector<1x1x2xf32>,
    return
  }
  func.func @transform_0(%arg0: i32) -> (i32, i32) {
    %c0_i32 = arith.constant 0 : i32
    %c0_i32_0 = arith.constant 0 : i32
    return %arg0, %c0_i32 : i32, i32
  }
  func.func @transform_1(%arg0: i32) -> (i32, i32) {
    %c0_i32 = arith.constant 0 : i32
    %c0_i32_0 = arith.constant 0 : i32
    %c0_i32_1 = arith.constant 0 : i32
    return %c0_i32, %c0_i32_0 : i32, i32
  }
  func.func @transform_2(%arg0: i32) -> (i32, i32, i32) {
    %c0_i32 = arith.constant 0 : i32
    %c0_i32_0 = arith.constant 0 : i32
    %c0_i32_1 = arith.constant 0 : i32
    %c0_i32_2 = arith.constant 0 : i32
    return %c0_i32, %c0_i32_0, %c0_i32_1 : i32, i32, i32
  }
  func.func @transform_3(%arg0: i32) -> (i32, i32, i32) {
    %c0_i32 = arith.constant 0 : i32
    %c0_i32_0 = arith.constant 0 : i32
    %c0_i32_1 = arith.constant 0 : i32
    %c0_i32_2 = arith.constant 0 : i32
    return %c0_i32, %c0_i32_0, %c0_i32_1 : i32, i32, i32
  }
  func.func @transform_4(%arg0: i32) -> (i32, i32, i32) {
    %c0_i32 = arith.constant 0 : i32
    %c0_i32_0 = arith.constant 0 : i32
    %c0_i32_1 = arith.constant 0 : i32
    %c0_i32_2 = arith.constant 0 : i32
    return %c0_i32, %c0_i32_0, %c0_i32_1 : i32, i32, i32
  }
  func.func @transform_5(%arg0: i32) -> (i32, i32) {
    %c0_i32 = arith.constant 0 : i32
    %c0_i32_0 = arith.constant 0 : i32
    %c0_i32_1 = arith.constant 0 : i32
    return %c0_i32, %c0_i32_0 : i32, i32
  }
  func.func @transform_6(%arg0: i32) -> (i32, i32, i32) {
    %c0_i32 = arith.constant 0 : i32
    %c0_i32_0 = arith.constant 0 : i32
    %c0_i32_1 = arith.constant 0 : i32
    return %arg0, %c0_i32, %c0_i32_0 : i32, i32, i32
  }
}

</mosaic_0001>

<bundles_post_ra>
// kernel: simple_transformer_forward.1
= control target key start
LH: loop header
LB: loop body
LE: loop exit
PB: predicated region body
PF: predicated region fallthrough
CT: control target
= control target key end

     0   :  { %11 = vsyncpa [#allocation3], 0  ;;  %s2107_s0 = inlined_call_operand.vmem [shape: s32[16,1], index: 0, kind: input, shape index: {}]   ;;  %s2108_s1 = inlined_call_operand.vmem [shape: f32[192,32], index: 1, kind: input, shape index: {}]   ;;  %s2109_s2 = inlined_call_operand.vmem [shape: bf16[2,32,192], index: 2, kind: input, shape index: {}]   ;;  %s2110_s3 = inlined_call_operand.vmem [shape: bf16[2,96,32], index: 3, kind: input, shape index: {}]   ;;  %s2111_s4 = inlined_call_operand.vmem [shape: f32[2,8,128], index: 4, kind: input, shape index: {}]   ;;  %s2112_s5 = inlined_call_operand.vmem [shape: f32[35,32], index: 5, kind: input, shape index: {}]   ;;  %s2113_s6 = inlined_call_operand.hbm [shape: f32[2,1,2], index: 6, kind: output, shape index: {}]  }
   0x1   :  { %13 = vsyncpa [#allocation3 + $0x1], 0  ;;  %s1713_s21 = smov 0   ;;  %s1715_s22 = smov 0  }
   0x2   :  { %s1717_s23 = smov 0   ;;  %s1719_s24 = smov 0  }
   0x3 LB: > { %s1734_s25 = sadd.s32 4294967295, %s1665_s24   ;;  %s1357_s26 = sadd.s32 4294967294, %s1665_s24   ;;  %s1665_s24 = sphi %s1719_s24, %s2125_s24   ;;  %s1661_s23 = sphi %s1717_s23, %s2124_s23   ;;  %s1657_s22 = sphi %s1715_s22, %s2123_s22   ;;  %s1653_s21 = sphi %s1713_s21, %s2122_s21  }
   0x4   : > { %s1738_s27 = sadd.s32 1, %s1665_s24   ;;  %s157_s28 = sadd.s32 1, %s1661_s23 }
   0x5   : > { %s154_s29 = ssub.s32 %s1665_s24, %s1738_s27  ;;  %p167_p0 = scmp.ne.s32.totalorder %s1661_s23, %s1657_s22 }
   0x6   : > { %p155_p1 = scmp.eq.s32.totalorder %s154_s29, 0  ;;  %p168_p2 = scmp.eq.s32.totalorder %s1734_s25, 1 }
   0x7   : > { %p173_p3 = scmp.ne.s32.totalorder %s1657_s22, %s1653_s21  ;;  %p174_p4 = scmp.eq.s32.totalorder %s1357_s26, 1 }
   0x8   : > { %s1749_s30 = scalar_select %p155_p1, %s1661_s23, %s157_s28  }
   0x9   : > { %p1751_p5 = por %p168_p2, %p167_p0  ;;  %p1755_p6 = por %p174_p4, %p173_p3 }
   0xa   : > { %p1360_p7 = scmp.ge.s32.totalorder %s1665_s24, 1  ;;  %p214_p8 = scmp.lt.s32.totalorder %s1665_s24, 3 }
   0xc   : > { %p215_p9 = pnand %p1360_p7, %p214_p8 }
   0xd   : > { %p242_p10 = scmp.lt.s32.totalorder (!%p215_p9), %s1734_s25, 1  ;;  %s1670_s14 = smov (!%p215_p9), 104  }
   0xe   : > { %218 = sbr.rel (%p215_p9) target bundleno = 4599 (0x11f7), region = 44  ;;  %s1671_s15 = smov (!%p215_p9), 96  }
   0xf   : > { %s1673_s17 = smov (!%p215_p9), 64   ;;  %s2116_s18 = smov (!%p215_p9), 8  }
  0x10   : > { %s2115_s19 = smov (!%p215_p9), 16   ;;  %s2114_s20 = smov (!%p215_p9), 24  }
  0x11   : > { %s1298_s28 = scalar_lea.hbm (!%p215_p9), %s2113_s6, %s1734_s25  ;;  %s1623_s12 = scalar_lea.hbm (!%p215_p9), %s2113_s6, 2 }
  0x12   : > { %s1302_s10 = sshll.u32 (!%p215_p9), %s1298_s28, 4  ;;  %s1303_s10 = int_to_ptr.hbm [resolvable:$true] %s1302_s10 }
  0x13   : > { %v271_v0 = vld [vmem:[%s2108_s1 + $0x78] sm:$0xff]  ;;  %v270_v1 = vld [vmem:[%s2108_s1 + $0x70] sm:$0xff]  ;;  %v1667_v2 = vmov 0   ;;  %s243_s13 = scalar_select %p242_p10, %s1734_s25, 1  ;;  %v269_v3 = vld [vmem:[%s2108_s1 + $0x68] sm:$0xff]  ;;  %v248_v18 = vlaneseq  ;;  %v1668_v21 = vmov 1.0  }
  0x14   : > { %1558 = vset.pattern.permute.xlu0 %v1667_v2  ;;  %273 = vmatpush.msra.mxu0 %v271_v0  ;;  %v268_v4 = vld [vmem:[%s2108_s1 + $0x60] sm:$0xff]  ;;  %v267_v6 = vld [vmem:[%s2108_s1 + $0x58] sm:$0xff]  ;;  %v266_v7 = vld [vmem:[%s2108_s1 + $0x50] sm:$0xff]  ;;  %vm326_vm1 = vcmask 261120   ;;  %vm362_vm2 = vcmask 64512   ;;  %vm511_vm3 = vcmask 1043456  }
  0x15   : > { %s1361_s16 = sshll.u32 %s243_s13, 3  ;;  %v265_v8 = vld [vmem:[%s2108_s1 + $0x48] sm:$0xff]  ;;  %v264_v9 = vld [vmem:[%s2108_s1 + $0x40] sm:$0xff]  ;;  %v263_v10 = vld [vmem:[%s2108_s1 + $0x38] sm:$0xff]  ;;  %v249_v19 = vand.u32 127, %v248_v18  ;;  %s1669_s13 = smov 120  }
  0x16   : > { %274 = vmatpush.msra.mxu0 %v270_v1  ;;  %s245_s26 = scalar_lea.vmem %s2107_s0, %s1361_s16  ;;  %v262_v11 = vld [vmem:[%s2108_s1 + $0x30] sm:$0xff]  ;;  %v261_v12 = vld [vmem:[%s2108_s1 + $0x28] sm:$0xff]  ;;  %v260_v13 = vld [vmem:[%s2108_s1 + $0x20] sm:$0xff]  ;;  %s1672_s16 = smov 112   ;;  %vm604_vm4 = vcmask 130048   ;;  %vm606_vm5 = vcmask 195584  }
  0x17   : > { %v247_v5 = vld [vmem:[%s245_s26] sm:$0xff]  ;;  %v259_v14 = vld [vmem:[%s2108_s1 + $0x18] sm:$0xff]  ;;  %v258_v15 = vld [vmem:[%s2108_s1 + $0x10] sm:$0xff]  ;;  %vm725_vm10 = vcmask 523264  }
  0x18   : > { %275 = vmatpush.msra.mxu0 %v269_v3  ;;  %251 = vperm.xlu0 %1558, %v247_v5   ;;  %v257_v16 = vld [vmem:[%s2108_s1 + $0x8] sm:$0xff]  ;;  %v256_v17 = vld [vmem:[%s2108_s1] sm:$0xff]  ;;  %v1370_v22 = vld [vmem:[%s2109_s2 + $0x10] sm:$0xf] }
  0x19   : > { %v1491_v23 = vld [vmem:[%s2109_s2 + $0x14] sm:$0xf0]  ;;  %v1366_v25 = vld [vmem:[%s2109_s2] sm:$0xf]  ;;  %v1489_v26 = vld [vmem:[%s2109_s2 + $0x4] sm:$0xf0] }
  0x1a   : > { %276 = vmatpush.msra.mxu0 %v268_v4  ;;  %v1371_v24 = vor.u32 %v1491_v23, %v1370_v22  ;;  %v1367_v27 = vor.u32 %v1489_v26, %v1366_v25  ;;  %v272_v28 = vld [vmem:[%s2108_s1 + $0x80] sm:$0xff] }
  0x1b   : > { %v1837_v33 = vld [vmem:[%s2111_s4] sm:$0xff] }
  0x1c   : > { %277 = vmatpush.msra.mxu0 %v267_v6  ;;  %336 = vmatpush.bf16.msra.mxu1 %v1371_v24  ;;  %v313_v34 = vperm.slane %v1837_v33, 0 }
  0x1e   : > { %278 = vmatpush.msra.mxu0 %v266_v7 }
  0x20   : > { %279 = vmatpush.msra.mxu0 %v265_v8  ;;  %337 = vmatpush.bf16.msra.mxu1 %v1367_v27 }
  0x22   : > { %280 = vmatpush.msra.mxu0 %v264_v9 }
  0x24   : > { %281 = vmatpush.msra.mxu0 %v263_v10 }
  0x26   : > { %282 = vmatpush.msra.mxu0 %v262_v11 }
  0x28   : > { %283 = vmatpush.msra.mxu0 %v261_v12 }
  0x2a   : > { %284 = vmatpush.msra.mxu0 %v260_v13 }
  0x2c   : > { %285 = vmatpush.msra.mxu0 %v259_v14 }
  0x2e   : > { %286 = vmatpush.msra.mxu0 %v258_v15 }
  0x30   : > { %287 = vmatpush.msra.mxu0 %v257_v16 }
  0x32   : > { %288 = vmatpush.msra.mxu0 %v256_v17 }
  0x8a   : > { %v252_v20 = vpop.permute.xlu0 %251 }
  0x8b   : > { %vm253_vm0 = vcmp.eq.s32.totalorder %v252_v20, %v249_v19 }
  0x8c   : > { %1363 = vmatmul.msk.f32.vlgmr.msra.gmra.mxu0 %vm253_vm0, %v1668_v21 }
 0x109   : > { %v290_v29 = vpop.f32.mrf.mxu0 }
 0x10a   : > { %v293_v30 = vmul.f32 5.656854, %v290_v29 }
 0x10c   : > { %v1829_v31 = vadd.f32 %v293_v30, %v272_v28 }
 0x10e   : > { %v312_v32 = vpack.c.bf16 %v1829_v31, %v1829_v31 }
 0x110   : > { %1372 = vmatmul.msk.bf16.vlgmr.msra.gmra.mxu1 %vm326_vm1, %v312_v32 }
 0x18d   : > { %v339_v35 = vpop.f32.mrf.mxu1 }
 0x18e   : > { %v340_v36 = vadd.f32 %v339_v35, %v313_v34 }
 0x190   : > { %344 = vrot.lane.b32.xlu1 %v340_v36, %s1669_s13  ;;  %350 = vrot.lane.b32.xlu0 %v340_v36, %s1670_s14  ;;  %v353_v37 = vpack.c.bf16 %v340_v36, %v340_v36 }
 0x192   : > { %v358_v38 = vunpack.c.l.b16 %v353_v37 }
 0x194   : > { %v1842_v39 = vpack.c.b16 %v358_v38, %v358_v38 }
 0x195   : > { %v341_v40 = vpop.f32.mrf.mxu1 }
 0x196   : > { %360 = vrot.lane.b32.xlu2 %v1842_v39, %s1671_s15 }
 0x198   : > { %347 = vrot.lane.b32.xlu1 %v340_v36, %s1672_s16 }
 0x1f0   : > { %v361_v41 = vpop.permute.xlu2 %360 }
 0x1f1   : > { %v367_v42 = vsel %vm362_vm2, %v361_v41, 0 }
 0x1f2   : > { %376 = vmatpush.bf16.xpose.msra.mxu2 %v367_v42 }
 0x1f9   : > { %1373 = vmatmul.msk.bf16.vlgmr.msra.gmra.mxu2 %vm362_vm2, %v353_v37 }
 0x202   : > { %v345_v43 = vpop.permute.xlu1 %344  ;;  %v351_v44 = vpop.permute.xlu0 %350 }
 0x203   : > { %v354_v45 = vpack.c.bf16 %v345_v43, %v345_v43  ;;  %v356_v46 = vpack.c.bf16 %v351_v44, %v351_v44 }
 0x205   : > { %v383_v47 = vunpack.c.l.b16 %v354_v45  ;;  %v431_v48 = vunpack.c.l.b16 %v356_v46 }
 0x207   : > { %v1849_v49 = vpack.c.b16 %v383_v47, %v383_v47  ;;  %v432_v50 = vpack.c.b16 %v431_v48, %v431_v48 }
 0x209   : > { %385 = vrot.lane.b32.xlu0 %v1849_v49, %s1671_s15  ;;  %433 = vrot.lane.b32.xlu2 %v432_v50, %s1671_s15 }
 0x20a   : > { %v348_v51 = vpop.permute.xlu1 %347 }
 0x20b   : > { %v355_v52 = vpack.c.bf16 %v348_v51, %v348_v51 }
 0x20d   : > { %v407_v53 = vunpack.c.l.b16 %v355_v52 }
 0x20f   : > { %v408_v54 = vpack.c.b16 %v407_v53, %v407_v53 }
 0x211   : > { %409 = vrot.lane.b32.xlu1 %v408_v54, %s1671_s15 }
 0x263   : > { %v434_v55 = vpop.permute.xlu2 %433 }
 0x264   : > { %v439_v56 = vsel %vm362_vm2, %v434_v55, 0 }
 0x265   : > { %448 = vmatpush.bf16.xpose.msrb.mxu2 %v439_v56 }
 0x26c   : > { %1376 = vmatmul.msk.bf16.vlgmr.msrb.gmra.mxu2 %vm362_vm2, %v356_v46 }
 0x27b   : > { %v386_v57 = vpop.permute.xlu0 %385 }
 0x27c   : > { %v378_v58 = vpop.f32.mrf.mxu2  ;;  %v391_v59 = vsel %vm362_vm2, %v386_v57, 0 }
 0x27d   : > { %400 = vmatpush.bf16.xpose.msra.mxu3 %v391_v59  ;;  %v454_v2 = vmul.f32 0.35355338, %v378_v58 }
 0x27f   : > { %v458_v4 = vsel %vm362_vm2, %v454_v2, -inf }
 0x283   : > { %v410_v60 = vpop.permute.xlu1 %409 }
 0x284   : > { %v380_v61 = vpop.f32.mrf.mxu2  ;;  %1374 = vmatmul.msk.bf16.vlgmr.msra.gmra.mxu3 %vm362_vm2, %v354_v45  ;;  %v415_v62 = vsel %vm362_vm2, %v410_v60, 0 }
 0x285   : > { %424 = vmatpush.bf16.xpose.msrb.mxu1 %v415_v62 }
 0x28c   : > { %1375 = vmatmul.msk.bf16.vlgmr.msrb.gmra.mxu1 %vm362_vm2, %v355_v52 }
 0x2ef   : > { %v450_v63 = vpop.f32.mrf.mxu2 }
 0x2f0   : > { %v457_v0 = vmul.f32 0.35355338, %v450_v63 }
 0x2f2   : > { %v467_v1 = vsel %vm362_vm2, %v457_v0, -inf }
 0x2f3   : > { %468 = vmax.xlane.f32.xlu2 %v467_v1 }
 0x2f7   : > { %v452_v3 = vpop.f32.mrf.mxu2 }
 0x2f8   : > { %v1493_v3 = vld [vmem:[%s2110_s3 + $0x8] sm:$0xff] }
 0x2fb   : > { %459 = vmax.xlane.f32.xlu2 %v458_v4  ;;  %v1492_v4 = vld [vmem:[%s2110_s3] sm:$0xff] }
 0x307   : > { %v402_v5 = vpop.f32.mrf.mxu3 }
 0x308   : > { %v455_v6 = vmul.f32 0.35355338, %v402_v5 }
 0x309   : > { %v426_v7 = vpop.f32.mrf.mxu1 }
 0x30a   : > { %v456_v8 = vmul.f32 0.35355338, %v426_v7  ;;  %v461_v9 = vsel %vm362_vm2, %v455_v6, -inf }
 0x30b   : > { %462 = vmax.xlane.f32.xlu0 %v461_v9 }
 0x30c   : > { %v464_v10 = vsel %vm362_vm2, %v456_v8, -inf }
 0x30d   : > { %465 = vmax.xlane.f32.xlu1 %v464_v10 }
 0x30f   : > { %v404_v11 = vpop.f32.mrf.mxu3 }
 0x311   : > { %v428_v12 = vpop.f32.mrf.mxu1 }
 0x312   : > { %v609_v12 = vperm.slane %v1837_v33, 1 }
 0x366   : > { %v469_v13 = vpop.xlane.xlu2 %468 }
 0x367   : > { %v473_v14 = vsub.f32 %v457_v0, %v469_v13 }
 0x369   : > { %v480_v15 = vmul.f32 1.442695, %v473_v14 }
 0x36b   : > { %1559 = vpow2.f32 %v480_v15 }
 0x36e   : > { %v460_v28 = vpop.xlane.xlu2 %459 }
 0x36f   : > { %v470_v29 = vsub.f32 %v454_v2, %v460_v28 }
 0x371   : > { %v1560_v16 = vpop.eup %1559  ;;  %v474_v30 = vmul.f32 1.442695, %v470_v29  ;;  %v1490_v29 = vld [vmem:[%s2109_s2 + $0x14] sm:$0xf] }
 0x372   : > { %v491_v17 = vsel %vm362_vm2, %v1560_v16, 0.0 }
 0x373   : > { %492 = vadd.xlane.f32.xlu2 %v491_v17 }
 0x37e   : > { %v463_v18 = vpop.xlane.xlu0 %462 }
 0x37f   : > { %v471_v19 = vsub.f32 %v455_v6, %v463_v18  ;;  %v1677_v18 = vmov 32.0  }
 0x380   : > { %v466_v20 = vpop.xlane.xlu1 %465 }
 0x381   : > { %v476_v21 = vmul.f32 1.442695, %v471_v19  ;;  %v472_v22 = vsub.f32 %v456_v8, %v466_v20 }
 0x383   : > { %1561 = vpow2.f32 %v476_v21  ;;  %v478_v23 = vmul.f32 1.442695, %v472_v22 }
 0x385   : > { %1563 = vpow2.f32 %v478_v23 }
 0x386   : > { %1565 = vpow2.f32 %v474_v30  ;;  %v1394_v30 = vld [vmem:[%s2109_s2 + $0x18] sm:$0xf0] }
 0x389   : > { %v1562_v24 = vpop.eup %1561 }
 0x38a   : > { %v485_v25 = vsel %vm362_vm2, %v1562_v24, 0.0 }
 0x38b   : > { %v1564_v26 = vpop.eup %1563  ;;  %486 = vadd.xlane.f32.xlu0 %v485_v25  ;;  %570 = vrot.lane.b32.xlu2 %v432_v50, %s1673_s17 }
 0x38c   : > { %v488_v27 = vsel %vm362_vm2, %v1564_v26, 0.0  ;;  %v1566_v32 = vpop.eup %1565 }
 0x38d   : > { %489 = vadd.xlane.f32.xlu1 %v488_v27  ;;  %v482_v34 = vsel %vm362_vm2, %v1566_v32, 0.0 }
 0x393   : > { %506 = vrot.lane.b32.xlu2 %v1842_v39, %s1673_s17 }
 0x39f   : > { %528 = vrot.lane.b32.xlu0 %v1849_v49, %s1673_s17 }
 0x3a6   : > { %549 = vrot.lane.b32.xlu1 %v408_v54, %s1673_s17 }
 0x3c9   : > { %483 = vadd.xlane.f32.xlu0 %v482_v34  ;;  %v1488_v34 = vld [vmem:[%s2109_s2 + $0x4] sm:$0xf] }
 0x3e6   : > { %v493_v35 = vpop.xlane.xlu2 %492 }
 0x3e7   : > { %1567 = vrcp.f32 %v493_v35  ;;  %v1390_v35 = vld [vmem:[%s2109_s2 + $0x8] sm:$0xf0] }
 0x3ed   : > { %v1568_v36 = vpop.eup %1567 }
 0x3ee   : > { %v501_v37 = vmul.f32 %v1568_v36, %v1560_v16  ;;  %v571_v38 = vpop.permute.xlu2 %570  ;;  %v1393_v36 = vor.u32 %v1488_v34, %v1390_v35  ;;  %v1960_v34 = vld [vmem:[%s2111_s4 + $0x8] sm:$0xff] }
 0x3ef   : > { %v576_v39 = vsel %vm511_vm3, %v571_v38, 0  ;;  %v790_v35 = vperm.slane %v1960_v34, 0 }
 0x3f0   : > { %v505_v40 = vpack.c.bf16 %v501_v37, %v501_v37  ;;  %585 = vmatpush.bf16.msra.mxu2 %v576_v39  ;;  %v1497_v37 = vld [vmem:[%s2110_s3 + $0x28] sm:$0xff] }
 0x3f3   : > { %1380 = vmatmul.msk.bf16.vlgmr.msra.gmra.mxu2 %vm362_vm2, %v505_v40  ;;  %v1496_v40 = vld [vmem:[%s2110_s3 + $0x20] sm:$0xff] }
 0x3f6   : > { %v507_v41 = vpop.permute.xlu2 %506 }
 0x3f7   : > { %v513_v42 = vsel %vm511_vm3, %v507_v41, 0 }
 0x3f8   : > { %522 = vmatpush.bf16.msrb.mxu3 %v513_v42 }
 0x3fc   : > { %631 = vmatpush.bf16.msra.mxu3 %v1493_v3 }
 0x3fe   : > { %v487_v43 = vpop.xlane.xlu0 %486 }
 0x3ff   : > { %1569 = vrcp.f32 %v487_v43 }
 0x400   : > { %v490_v44 = vpop.xlane.xlu1 %489  ;;  %632 = vmatpush.bf16.msra.mxu3 %v1492_v4 }
 0x401   : > { %1571 = vrcp.f32 %v490_v44 }
 0x405   : > { %v1570_v45 = vpop.eup %1569 }
 0x406   : > { %v499_v46 = vmul.f32 %v1570_v45, %v1562_v24 }
 0x407   : > { %v1572_v49 = vpop.eup %1571 }
 0x408   : > { %v503_v50 = vpack.c.bf16 %v499_v46, %v499_v46  ;;  %v500_v51 = vmul.f32 %v1572_v49, %v1564_v26 }
 0x40a   : > { %v504_v54 = vpack.c.bf16 %v500_v51, %v500_v51 }
 0x411   : > { %v529_v47 = vpop.permute.xlu0 %528 }
 0x412   : > { %v534_v48 = vsel %vm511_vm3, %v529_v47, 0 }
 0x413   : > { %543 = vmatpush.bf16.msrb.mxu0 %v534_v48  ;;  %v668_v48 = vperm.slane %v1837_v33, 4 }
 0x416   : > { %1378 = vmatmul.msk.bf16.vlgmr.msrb.gmra.mxu0 %vm362_vm2, %v503_v50  ;;  %v670_v50 = vperm.slane %v1837_v33, 5 }
 0x418   : > { %v550_v52 = vpop.permute.xlu1 %549 }
 0x419   : > { %v555_v53 = vsel %vm511_vm3, %v550_v52, 0 }
 0x41a   : > { %564 = vmatpush.bf16.msra.mxu1 %v555_v53 }
 0x41d   : > { %1379 = vmatmul.msk.bf16.vlgmr.msra.gmra.mxu1 %vm362_vm2, %v504_v54 }
 0x41e   : > { %733 = vmatpush.bf16.msrb.mxu1 %v1497_v37 }
 0x422   : > { %734 = vmatpush.bf16.msrb.mxu1 %v1496_v40 }
 0x43c   : > { %v484_v55 = vpop.xlane.xlu0 %483 }
 0x43d   : > { %1573 = vrcp.f32 %v484_v55  ;;  %v1495_v55 = vld [vmem:[%s2110_s3 + $0x18] sm:$0xff] }
 0x43e   : > { %1575 = vrcp.f32 %v1677_v18  ;;  %735 = vmatpush.bf16.msrb.mxu1 %v1495_v55 }
 0x443   : > { %v1574_v56 = vpop.eup %1573 }
 0x444   : > { %v498_v57 = vmul.f32 %v1574_v56, %v1566_v32  ;;  %v1576_v19 = vpop.eup %1575  ;;  %v1397_v32 = vor.u32 %v1490_v29, %v1394_v30  ;;  %v1494_v56 = vld [vmem:[%s2110_s3 + $0x10] sm:$0xff] }
 0x445   : > { %v643_v20 = vmul.f32 32.0, %v1576_v19  ;;  %vm647_vm6 = vweird.f32 %v1576_v19  ;;  %736 = vmatpush.bf16.msrb.mxu1 %v1494_v56 }
 0x446   : > { %v502_v58 = vpack.c.bf16 %v498_v57, %v498_v57  ;;  %691 = vmatpush.bf16.msra.mxu0 %v1397_v32  ;;  %v673_v57 = vperm.slane %v1837_v33, 2 }
 0x447   : > { %v644_v21 = vsub.f32 1.0, %v643_v20 }
 0x448   : > { %1377 = vmatmul.msk.bf16.vlgmr.msrb.gmra.mxu3 %vm362_vm2, %v502_v58 }
 0x449   : > { %v645_v22 = vmul.f32 %v1576_v19, %v644_v21 }
 0x44a   : > { %692 = vmatpush.bf16.msra.mxu0 %v1393_v36 }
 0x44b   : > { %v646_v23 = vadd.f32 %v1576_v19, %v645_v22 }
 0x44d   : > { %v1899_v24 = vsel %vm647_vm6, %v1576_v19, %v646_v23 }
 0x476   : > { %v587_v59 = vpop.f32.mrf.mxu2 }
 0x47e   : > { %v589_v60 = vpop.f32.mrf.mxu2 }
 0x493   : > { %v545_v61 = vpop.f32.mrf.mxu0 }
 0x494   : > { %592 = vrot.lane.b32.xlu1 %v545_v61, %s2116_s18  ;;  %s1617_s18 = sshra.s32 %s1303_s10, 4  ;;  %s1618_s18 = int_to_ptr.hbm [resolvable:$true] %s1617_s18 }
 0x495   : > { %p1624_p0 = scmp.lt.s32.totalorder %s1618_s18, %s2113_s6 }
 0x49a   : > { %v566_v62 = vpop.f32.mrf.mxu1 }
 0x49b   : > { %v547_v63 = vpop.f32.mrf.mxu0  ;;  %596 = vrot.lane.b32.xlu2 %v566_v62, %s2115_s19  ;;  %s1619_s19 = scalar_lea.hbm %s1618_s18, 1 }
 0x49c   : > { %600 = vrot.lane.b32.xlu1 %v587_v59, %s2114_s20  ;;  %v700_v63 = vperm.slane %v1837_v33, 3  ;;  %p1620_p11 = scmp.ne.s32.totalorder %s1618_s18, %s1619_s19  ;;  %p1625_p1 = scmp.lt.s32.totalorder %s1623_s12, %s1619_s19 }
 0x49e   : > { %p1621_p12 = pnand %p1620_p11, %p1751_p5  ;;  %p1626_p2 = por %p1625_p1, %p1624_p0 }
 0x4a0   : > { %p1622_p13 = pneg %p1621_p12 }
 0x4a2   : > { %v568_v0 = vpop.f32.mrf.mxu1  ;;  %p1627_p3 = pnand %p1626_p2, %p1622_p13 }
 0x4cb   : > { %v524_v1 = vpop.f32.mrf.mxu3 }
 0x4d3   : > { %v526_v2 = vpop.f32.mrf.mxu3 }
 0x4f5   : > { %v597_v7 = vpop.permute.xlu2 %596 }
 0x506   : > { %v593_v5 = vpop.permute.xlu1 %592 }
 0x507   : > { %v603_v6 = vsel %vm362_vm2, %v524_v1, %v593_v5 }
 0x508   : > { %v605_v8 = vsel %vm604_vm4, %v603_v6, %v597_v7 }
 0x50e   : > { %v601_v9 = vpop.permute.xlu1 %600 }
 0x50f   : > { %v607_v10 = vsel %vm606_vm5, %v605_v8, %v601_v9 }
 0x510   : > { %v608_v11 = vpack.c.bf16 %v607_v10, %v607_v10  ;;  %v1439_v10 = vld [vmem:[%s2109_s2 + $0x30] sm:$0xf] }
 0x512   : > { %1389 = vmatmul.msk.bf16.vlgmr.msra.gmra.mxu3 %vm326_vm1, %v608_v11  ;;  %v1501_v11 = vld [vmem:[%s2109_s2 + $0x34] sm:$0xf0] }
 0x595   : > { %v634_v13 = vpop.f32.mrf.mxu3 }
 0x596   : > { %v635_v14 = vadd.f32 %v634_v13, %v609_v12  ;;  %v1440_v12 = vor.u32 %v1501_v11, %v1439_v10  ;;  %v1435_v13 = vld [vmem:[%s2109_s2 + $0x20] sm:$0xf] }
 0x598   : > { %v638_v15 = vadd.f32 %v635_v14, %v1829_v31  ;;  %812 = vmatpush.bf16.msrb.mxu2 %v1440_v12  ;;  %v1499_v14 = vld [vmem:[%s2109_s2 + $0x24] sm:$0xf0] }
 0x59a   : > { %v639_v16 = vsel %vm326_vm1, %v638_v15, 0.0 }
 0x59b   : > { %640 = vadd.xlane.f32.xlu2 %v639_v16 }
 0x59d   : > { %v636_v17 = vpop.f32.mrf.mxu3 }
 0x60e   : > { %v641_v25 = vpop.xlane.xlu2 %640 }
 0x60f   : > { %v649_v26 = vmul.f32 %v1899_v24, %v641_v25 }
 0x611   : > { %v650_v27 = vsub.f32 %v638_v15, %v649_v26  ;;  %v1436_v15 = vor.u32 %v1499_v14, %v1435_v13  ;;  %v765_v26 = vperm.slane %v1837_v33, 6 }
 0x613   : > { %v651_v28 = vmul.f32 %v650_v27, %v650_v27  ;;  %813 = vmatpush.bf16.msrb.mxu2 %v1436_v15 }
 0x615   : > { %v652_v31 = vsel %vm326_vm1, %v651_v28, 0.0  ;;  %v767_v28 = vperm.slane %v1837_v33, 7 }
 0x616   : > { %653 = vadd.xlane.f32.xlu1 %v652_v31 }
 0x689   : > { %v654_v38 = vpop.xlane.xlu1 %653 }
 0x68a   : > { %v655_v39 = vmul.f32 %v654_v38, %v1899_v24 }
 0x68c   : > { %v656_v41 = vadd.f32 1e-05, %v655_v39 }
 0x68e   : > { %1577 = vrsqrt.f32 %v656_v41  ;;  %vm663_vm8 = vweird.f32 %v656_v41 }
 0x694   : > { %v1578_v42 = vpop.eup %1577 }
 0x695   : > { %v658_v43 = vmul.f32 %v1578_v42, %v656_v41  ;;  %vm664_vm7 = vweird.f32 %v1578_v42 }
 0x696   : > { %vm665_vm9 = vmor %vm663_vm8, %vm664_vm7 }
 0x697   : > { %v659_v44 = vmul.f32 %v1578_v42, %v658_v43 }
 0x699   : > { %v660_v45 = vmul.f32 0.5, %v659_v44 }
 0x69b   : > { %v661_v46 = vsub.f32 1.5, %v660_v45 }
 0x69d   : > { %v662_v47 = vmul.f32 %v1578_v42, %v661_v46 }
 0x69f   : > { %v666_v49 = vsel %vm665_vm9, %v1578_v42, %v662_v47  ;;  %vm1287_vm9 = vcmask 8192  }
 0x6a0   : > { %v667_v51 = vmul.f32 %v666_v49, %v650_v27 }
 0x6a2   : > { %v669_v52 = vmul.f32 %v668_v48, %v667_v51 }
 0x6a4   : > { %v671_v53 = vadd.f32 %v670_v50, %v669_v52 }
 0x6a6   : > { %v672_v54 = vpack.c.bf16 %v671_v53, %v671_v53 }
 0x6a8   : > { %1398 = vmatmul.msk.bf16.vlgmr.msra.gmra.mxu0 %vm326_vm1, %v672_v54 }
 0x725   : > { %v694_v58 = vpop.f32.mrf.mxu0 }
 0x726   : > { %v695_v59 = vadd.f32 %v694_v58, %v673_v57 }
 0x728   : > { %v698_v60 = vmax.f32 %v695_v59, 0.0 }
 0x72a   : > { %v699_v61 = vpack.c.bf16 %v698_v60, %v698_v60 }
 0x72c   : > { %1415 = vmatmul.msk.bf16.vlgmr.msrb.gmra.mxu1 %vm725_vm10, %v699_v61 }
 0x72d   : > { %v696_v62 = vpop.f32.mrf.mxu0 }
 0x7a9   : > { %v738_v0 = vpop.f32.mrf.mxu1 }
 0x7aa   : > { %v739_v1 = vadd.f32 %v738_v0, %v700_v63 }
 0x7ac   : > { %v742_v2 = vadd.f32 %v739_v1, %v671_v53 }
 0x7ae   : > { %v743_v3 = vsel %vm326_vm1, %v742_v2, 0.0 }
 0x7af   : > { %744 = vadd.xlane.f32.xlu0 %v743_v3 }
 0x7b1   : > { %v740_v4 = vpop.f32.mrf.mxu1 }
 0x822   : > { %v745_v5 = vpop.xlane.xlu0 %744 }
 0x823   : > { %v746_v6 = vmul.f32 %v745_v5, %v1899_v24 }
 0x825   : > { %v747_v7 = vsub.f32 %v742_v2, %v746_v6 }
 0x827   : > { %v748_v8 = vmul.f32 %v747_v7, %v747_v7 }
 0x829   : > { %v749_v9 = vsel %vm326_vm1, %v748_v8, 0.0 }
 0x82a   : > { %750 = vadd.xlane.f32.xlu0 %v749_v9 }
 0x89d   : > { %v751_v16 = vpop.xlane.xlu0 %750 }
 0x89e   : > { %v752_v17 = vmul.f32 %v751_v16, %v1899_v24 }
 0x8a0   : > { %v753_v18 = vadd.f32 1e-05, %v752_v17 }
 0x8a2   : > { %1579 = vrsqrt.f32 %v753_v18  ;;  %vm760_vm12 = vweird.f32 %v753_v18 }
 0x8a8   : > { %v1580_v19 = vpop.eup %1579 }
 0x8a9   : > { %v755_v20 = vmul.f32 %v1580_v19, %v753_v18  ;;  %vm761_vm11 = vweird.f32 %v1580_v19 }
 0x8aa   : > { %vm762_vm13 = vmor %vm760_vm12, %vm761_vm11 }
 0x8ab   : > { %v756_v21 = vmul.f32 %v1580_v19, %v755_v20 }
 0x8ad   : > { %v757_v22 = vmul.f32 0.5, %v756_v21 }
 0x8af   : > { %v758_v23 = vsub.f32 1.5, %v757_v22 }
 0x8b1   : > { %v759_v25 = vmul.f32 %v1580_v19, %v758_v23 }
 0x8b3   : > { %v763_v27 = vsel %vm762_vm13, %v1580_v19, %v759_v25 }
 0x8b4   : > { %v764_v31 = vmul.f32 %v763_v27, %v747_v7 }
 0x8b6   : > { %v766_v29 = vmul.f32 %v765_v26, %v764_v31 }
 0x8b8   : > { %v1952_v30 = vadd.f32 %v767_v28, %v766_v29 }
 0x8ba   : > { %v789_v32 = vpack.c.bf16 %v1952_v30, %v1952_v30 }
 0x8bc   : > { %1441 = vmatmul.msk.bf16.vlgmr.msrb.gmra.mxu2 %vm326_vm1, %v789_v32 }
 0x93f   : > { %v815_v36 = vpop.f32.mrf.mxu2 }
 0x940   : > { %v816_v37 = vadd.f32 %v815_v36, %v790_v35 }
 0x942   : > { %823 = vrot.lane.b32.xlu1 %v816_v37, %s1672_s16  ;;  %820 = vrot.lane.b32.xlu2 %v816_v37, %s1669_s13  ;;  %v829_v33 = vpack.c.bf16 %v816_v37, %v816_v37  ;;  %s2119_s13 = smov 8   ;;  %s240_s16 = sand.u32 1, %s1657_s22  }
 0x943   : > { %826 = vrot.lane.b32.xlu0 %v816_v37, %s1670_s14  ;;  %s2120_s14 = smov 16   ;;  %s241_s29 = scalar_lea.vmem [#allocation2], %s240_s16 }
 0x944   : > { %v834_v38 = vunpack.c.l.b16 %v829_v33  ;;  %s1300_s9 = sshll.u32 %s241_s29, 4  ;;  %s1290_s11 = scalar_lea.sflag [#allocation3], %s240_s16  ;;  %s1301_s9 = int_to_ptr.vmem [resolvable:$true] %s1300_s9 }
 0x946   : > { %v835_v40 = vpack.c.b16 %v834_v38, %v834_v38 }
 0x947   : > { %v817_v39 = vpop.f32.mrf.mxu2 }
 0x94a   : > { %836 = vrot.lane.b32.xlu1 %v835_v40, %s1671_s15 }
 0x99c   : > { %v821_v41 = vpop.permute.xlu2 %820 }
 0x99d   : > { %v830_v42 = vpack.c.bf16 %v821_v41, %v821_v41 }
 0x99f   : > { %v858_v43 = vunpack.c.l.b16 %v830_v42 }
 0x9a1   : > { %v859_v44 = vpack.c.b16 %v858_v43, %v858_v43 }
 0x9a3   : > { %860 = vrot.lane.b32.xlu2 %v859_v44, %s1671_s15 }
 0x9b4   : > { %v824_v45 = vpop.permute.xlu1 %823 }
 0x9b5   : > { %v827_v46 = vpop.permute.xlu0 %826  ;;  %v831_v49 = vpack.c.bf16 %v824_v45, %v824_v45 }
 0x9b6   : > { %v832_v47 = vpack.c.bf16 %v827_v46, %v827_v46 }
 0x9b7   : > { %v882_v53 = vunpack.c.l.b16 %v831_v49 }
 0x9b8   : > { %v906_v48 = vunpack.c.l.b16 %v832_v47 }
 0x9b9   : > { %v883_v54 = vpack.c.b16 %v882_v53, %v882_v53 }
 0x9ba   : > { %v1968_v50 = vpack.c.b16 %v906_v48, %v906_v48 }
 0x9bc   : > { %908 = vrot.lane.b32.xlu0 %v1968_v50, %s1671_s15  ;;  %v837_v51 = vpop.permute.xlu1 %836 }
 0x9bd   : > { %v842_v52 = vsel %vm362_vm2, %v837_v51, 0 }
 0x9be   : > { %851 = vmatpush.bf16.xpose.msrb.mxu3 %v842_v52 }
 0x9c4   : > { %884 = vrot.lane.b32.xlu0 %v883_v54, %s1671_s15  ;;  %s2121_s15 = smov 24  }
 0x9c5   : > { %1442 = vmatmul.msk.bf16.vlgmr.msrb.gmra.mxu3 %vm362_vm2, %v829_v33 }
 0x9fd   : > { %v861_v55 = vpop.permute.xlu2 %860 }
 0x9fe   : > { %v866_v56 = vsel %vm362_vm2, %v861_v55, 0 }
 0x9ff   : > { %875 = vmatpush.bf16.xpose.msrb.mxu0 %v866_v56 }
 0xa06   : > { %1443 = vmatmul.msk.bf16.vlgmr.msrb.gmra.mxu0 %vm362_vm2, %v830_v42 }
 0xa2e   : > { %v909_v57 = vpop.permute.xlu0 %908 }
 0xa2f   : > { %v914_v58 = vsel %vm362_vm2, %v909_v57, 0 }
 0xa30   : > { %923 = vmatpush.bf16.xpose.msra.mxu2 %v914_v58 }
 0xa36   : > { %v885_v59 = vpop.permute.xlu0 %884 }
 0xa37   : > { %v890_v60 = vsel %vm362_vm2, %v885_v59, 0  ;;  %1445 = vmatmul.msk.bf16.vlgmr.msra.gmra.mxu2 %vm362_vm2, %v832_v47 }
 0xa38   : > { %899 = vmatpush.bf16.xpose.msra.mxu1 %v890_v60 }
 0xa3f   : > { %1444 = vmatmul.msk.bf16.vlgmr.msra.gmra.mxu1 %vm362_vm2, %v831_v49 }
 0xa48   : > { %v853_v61 = vpop.f32.mrf.mxu3 }
 0xa49   : > { %v929_v9 = vmul.f32 0.35355338, %v853_v61 }
 0xa4b   : > { %v933_v12 = vsel %vm362_vm2, %v929_v9, -inf }
 0xa50   : > { %v855_v62 = vpop.f32.mrf.mxu3 }
 0xa83   : > { %v877_v63 = vpop.f32.mrf.mxu0 }
 0xa84   : > { %v930_v0 = vmul.f32 0.35355338, %v877_v63 }
 0xa86   : > { %v936_v1 = vsel %vm362_vm2, %v930_v0, -inf }
 0xa87   : > { %937 = vmax.xlane.f32.xlu0 %v936_v1 }
 0xa8b   : > { %v879_v2 = vpop.f32.mrf.mxu0 }
 0xaba   : > { %v925_v3 = vpop.f32.mrf.mxu2 }
 0xabb   : > { %v932_v4 = vmul.f32 0.35355338, %v925_v3 }
 0xabc   : > { %v901_v5 = vpop.f32.mrf.mxu1 }
 0xabd   : > { %v931_v6 = vmul.f32 0.35355338, %v901_v5  ;;  %v942_v7 = vsel %vm362_vm2, %v932_v4, -inf  ;;  %v1502_v5 = vld [vmem:[%s2110_s3 + $0x30] sm:$0xff] }
 0xabe   : > { %943 = vmax.xlane.f32.xlu2 %v942_v7 }
 0xabf   : > { %v939_v8 = vsel %vm362_vm2, %v931_v6, -inf }
 0xac0   : > { %940 = vmax.xlane.f32.xlu1 %v939_v8 }
 0xac2   : > { %v927_v10 = vpop.f32.mrf.mxu2 }
 0xac4   : > { %v903_v11 = vpop.f32.mrf.mxu1 }
 0xac6   : > { %934 = vmax.xlane.f32.xlu2 %v933_v12 }
 0xafa   : > { %v938_v13 = vpop.xlane.xlu0 %937 }
 0xafb   : > { %v946_v14 = vsub.f32 %v930_v0, %v938_v13  ;;  %v1081_v13 = vperm.slane %v1960_v34, 1 }
 0xafd   : > { %v951_v15 = vmul.f32 1.442695, %v946_v14 }
 0xaff   : > { %1581 = vpow2.f32 %v951_v15 }
 0xb05   : > { %v1582_v16 = vpop.eup %1581 }
 0xb06   : > { %v960_v17 = vsel %vm362_vm2, %v1582_v16, 0.0 }
 0xb07   : > { %961 = vadd.xlane.f32.xlu1 %v960_v17 }
 0xb20   : > { %1002 = vrot.lane.b32.xlu1 %v859_v44, %s1673_s17 }
 0xb28   : > { %981 = vrot.lane.b32.xlu1 %v835_v40, %s1673_s17 }
 0xb31   : > { %v944_v18 = vpop.xlane.xlu2 %943 }
 0xb32   : > { %v948_v19 = vsub.f32 %v932_v4, %v944_v18  ;;  %v1503_v4 = vld [vmem:[%s2110_s3 + $0x38] sm:$0xff] }
 0xb33   : > { %v941_v20 = vpop.xlane.xlu1 %940 }
 0xb34   : > { %v955_v21 = vmul.f32 1.442695, %v948_v19  ;;  %v947_v22 = vsub.f32 %v931_v6, %v941_v20 }
 0xb36   : > { %1583 = vpow2.f32 %v955_v21  ;;  %v953_v23 = vmul.f32 1.442695, %v947_v22 }
 0xb38   : > { %1585 = vpow2.f32 %v953_v23 }
 0xb39   : > { %v935_v31 = vpop.xlane.xlu2 %934 }
 0xb3a   : > { %v945_v29 = vsub.f32 %v929_v9, %v935_v31 }
 0xb3c   : > { %v1584_v25 = vpop.eup %1583  ;;  %v949_v32 = vmul.f32 1.442695, %v945_v29  ;;  %v1507_v29 = vld [vmem:[%s2110_s3 + $0x58] sm:$0xff] }
 0xb3d   : > { %v966_v26 = vsel %vm362_vm2, %v1584_v25, 0.0 }
 0xb3e   : > { %v1586_v27 = vpop.eup %1585  ;;  %967 = vadd.xlane.f32.xlu0 %v966_v26  ;;  %1587 = vpow2.f32 %v949_v32 }
 0xb3f   : > { %v963_v28 = vsel %vm362_vm2, %v1586_v27, 0.0 }
 0xb40   : > { %964 = vadd.xlane.f32.xlu2 %v963_v28  ;;  %v1459_v28 = vld [vmem:[%s2109_s2 + $0x28] sm:$0xf0] }
 0xb44   : > { %v1588_v35 = vpop.eup %1587 }
 0xb45   : > { %v957_v36 = vsel %vm362_vm2, %v1588_v35, 0.0 }
 0xb52   : > { %1044 = vrot.lane.b32.xlu0 %v1968_v50, %s1673_s17 }
 0xb58   : > { %1023 = vrot.lane.b32.xlu2 %v883_v54, %s1673_s17 }
 0xb7a   : > { %v962_v37 = vpop.xlane.xlu1 %961 }
 0xb7b   : > { %1589 = vrcp.f32 %v962_v37 }
 0xb7c   : > { %958 = vadd.xlane.f32.xlu0 %v957_v36  ;;  %v1506_v36 = vld [vmem:[%s2110_s3 + $0x50] sm:$0xff] }
 0xb81   : > { %v1590_v33 = vpop.eup %1589 }
 0xb82   : > { %v974_v38 = vmul.f32 %v1590_v33, %v1582_v16 }
 0xb84   : > { %v978_v41 = vpack.c.bf16 %v974_v38, %v974_v38 }
 0xb92   : > { %v1003_v39 = vpop.permute.xlu1 %1002 }
 0xb93   : > { %v1008_v40 = vsel %vm511_vm3, %v1003_v39, 0 }
 0xb94   : > { %1017 = vmatpush.bf16.msra.mxu0 %v1008_v40 }
 0xb97   : > { %1447 = vmatmul.msk.bf16.vlgmr.msra.gmra.mxu0 %vm362_vm2, %v978_v41 }
 0xb9a   : > { %v982_v42 = vpop.permute.xlu1 %981 }
 0xb9b   : > { %v987_v43 = vsel %vm511_vm3, %v982_v42, 0 }
 0xb9c   : > { %996 = vmatpush.bf16.msra.mxu3 %v987_v43  ;;  %v1133_v43 = vperm.slane %v1960_v34, 4 }
 0xba0   : > { %1103 = vmatpush.bf16.msrb.mxu3 %v1503_v4 }
 0xba4   : > { %1104 = vmatpush.bf16.msrb.mxu3 %v1502_v5 }
 0xbb1   : > { %v968_v45 = vpop.xlane.xlu0 %967 }
 0xbb3   : > { %v965_v44 = vpop.xlane.xlu2 %964 }
 0xbb4   : > { %1591 = vrcp.f32 %v965_v44 }
 0xbb5   : > { %1593 = vrcp.f32 %v968_v45  ;;  %v1135_v45 = vperm.slane %v1960_v34, 5 }
 0xbba   : > { %v1592_v46 = vpop.eup %1591 }
 0xbbb   : > { %v975_v47 = vmul.f32 %v1592_v46, %v1586_v27  ;;  %v1024_v48 = vpop.permute.xlu2 %1023  ;;  %v1594_v51 = vpop.eup %1593  ;;  %v1498_v27 = vld [vmem:[%s2109_s2 + $0x24] sm:$0xf] }
 0xbbc   : > { %v1029_v49 = vsel %vm511_vm3, %v1024_v48, 0  ;;  %v976_v52 = vmul.f32 %v1594_v51, %v1584_v25  ;;  %v1500_v25 = vld [vmem:[%s2109_s2 + $0x34] sm:$0xf]  ;;  %v1462_v31 = vor.u32 %v1498_v27, %v1459_v28  ;;  %v1504_v51 = vld [vmem:[%s2110_s3 + $0x40] sm:$0xff] }
 0xbbd   : > { %v979_v50 = vpack.c.bf16 %v975_v47, %v975_v47  ;;  %1038 = vmatpush.bf16.msrb.mxu1 %v1029_v49  ;;  %v1233_v28 = vld [vmem:[%s2112_s5] sm:$0xff] }
 0xbbe   : > { %v980_v55 = vpack.c.bf16 %v976_v52, %v976_v52  ;;  %v1138_v52 = vperm.slane %v1960_v34, 2 }
 0xbc0   : > { %1448 = vmatmul.msk.bf16.vlgmr.msrb.gmra.mxu1 %vm362_vm2, %v979_v50  ;;  %v1505_v50 = vld [vmem:[%s2110_s3 + $0x48] sm:$0xff] }
 0xbc1   : > { %1197 = vmatpush.bf16.msra.mxu1 %v1507_v29 }
 0xbc4   : > { %v1045_v53 = vpop.permute.xlu0 %1044 }
 0xbc5   : > { %v1050_v54 = vsel %vm511_vm3, %v1045_v53, 0  ;;  %1198 = vmatpush.bf16.msra.mxu1 %v1506_v36 }
 0xbc6   : > { %1059 = vmatpush.bf16.msrb.mxu2 %v1050_v54 }
 0xbc9   : > { %1449 = vmatmul.msk.bf16.vlgmr.msrb.gmra.mxu2 %vm362_vm2, %v980_v55  ;;  %1199 = vmatpush.bf16.msra.mxu1 %v1505_v50 }
 0xbcd   : > { %1200 = vmatpush.bf16.msra.mxu1 %v1504_v51 }
 0xbef   : > { %v959_v56 = vpop.xlane.xlu0 %958 }
 0xbf0   : > { %1595 = vrcp.f32 %v959_v56 }
 0xbf6   : > { %v1596_v57 = vpop.eup %1595 }
 0xbf7   : > { %v973_v58 = vmul.f32 %v1596_v57, %v1588_v35 }
 0xbf9   : > { %v977_v59 = vpack.c.bf16 %v973_v58, %v973_v58  ;;  %v1165_v58 = vperm.slane %v1960_v34, 3 }
 0xbfb   : > { %1446 = vmatmul.msk.bf16.vlgmr.msra.gmra.mxu3 %vm362_vm2, %v977_v59 }
 0xc14   : > { %v1019_v60 = vpop.f32.mrf.mxu0 }
 0xc15   : > { %1066 = vrot.lane.b32.xlu2 %v1019_v60, %s2119_s13 }
 0xc1c   : > { %v1021_v61 = vpop.f32.mrf.mxu0 }
 0xc3d   : > { %v1040_v62 = vpop.f32.mrf.mxu1 }
 0xc3e   : > { %1070 = vrot.lane.b32.xlu1 %v1040_v62, %s2120_s14 }
 0xc45   : > { %v1042_v63 = vpop.f32.mrf.mxu1 }
 0xc4c   : > { %v1061_v0 = vpop.f32.mrf.mxu2 }
 0xc4d   : > { %1074 = vrot.lane.b32.xlu2 %v1061_v0, %s2121_s15 }
 0xc54   : > { %v1063_v1 = vpop.f32.mrf.mxu2 }
 0xc6f   : > { %v1067_v6 = vpop.permute.xlu2 %1066 }
 0xc7e   : > { %v998_v2 = vpop.f32.mrf.mxu3 }
 0xc7f   : > { %v1077_v7 = vsel %vm362_vm2, %v998_v2, %v1067_v6 }
 0xc86   : > { %v1000_v3 = vpop.f32.mrf.mxu3 }
 0xca7   : > { %v1075_v9 = vpop.permute.xlu2 %1074 }
 0xcb0   : > { %v1071_v8 = vpop.permute.xlu1 %1070 }
 0xcb1   : > { %v1078_v10 = vsel %vm604_vm4, %v1077_v7, %v1071_v8 }
 0xcb2   : > { %v1079_v11 = vsel %vm606_vm5, %v1078_v10, %v1075_v9  ;;  %vm1238_vm5 = vcmask 253952  }
 0xcb3   : > { %v1080_v12 = vpack.c.bf16 %v1079_v11, %v1079_v11 }
 0xcb5   : > { %1458 = vmatmul.msk.bf16.vlgmr.msrb.gmra.mxu3 %vm326_vm1, %v1080_v12 }
 0xd38   : > { %v1106_v14 = vpop.f32.mrf.mxu3 }
 0xd39   : > { %v1107_v15 = vadd.f32 %v1106_v14, %v1081_v13  ;;  %v1229_v14 = vperm.slane %v1960_v34, 6 }
 0xd3b   : > { %v1110_v16 = vadd.f32 %v1107_v15, %v1952_v30  ;;  %v1463_v30 = vld [vmem:[%s2109_s2 + $0x38] sm:$0xf0] }
 0xd3c   : > { %v1466_v26 = vor.u32 %v1500_v25, %v1463_v30 }
 0xd3d   : > { %v1111_v17 = vsel %vm326_vm1, %v1110_v16, 0.0 }
 0xd3e   : > { %1112 = vadd.xlane.f32.xlu1 %v1111_v17  ;;  %1156 = vmatpush.bf16.msrb.mxu0 %v1466_v26  ;;  %v1231_v17 = vperm.slane %v1960_v34, 7  ;;  %v1235_v26 = vld [vmem:[%s2112_s5 + $0x10] sm:$0xff]  ;;  %v1236_v34 = vld [vmem:[%s2112_s5 + $0x18] sm:$0xff] }
 0xd3f   : > { %v1268_v27 = vpack.c.bf16 %v1236_v34, %v1235_v26 }
 0xd40   : > { %v1108_v18 = vpop.f32.mrf.mxu3 }
 0xd41   : > { %1280 = vmatpush.bf16.msra.mxu2 %v1268_v27 }
 0xd42   : > { %1157 = vmatpush.bf16.msrb.mxu0 %v1462_v31  ;;  %v1234_v31 = vld [vmem:[%s2112_s5 + $0x8] sm:$0xff] }
 0xd43   : > { %v1267_v29 = vpack.c.bf16 %v1234_v31, %v1233_v28 }
 0xd45   : > { %1281 = vmatpush.bf16.msra.mxu2 %v1267_v29 }
 0xdb1   : > { %v1113_v19 = vpop.xlane.xlu1 %1112 }
 0xdb2   : > { %v1114_v20 = vmul.f32 %v1113_v19, %v1899_v24 }
 0xdb4   : > { %v1115_v21 = vsub.f32 %v1110_v16, %v1114_v20 }
 0xdb6   : > { %v1116_v22 = vmul.f32 %v1115_v21, %v1115_v21 }
 0xdb8   : > { %v1117_v23 = vsel %vm326_vm1, %v1116_v22, 0.0 }
 0xdb9   : > { %1118 = vadd.xlane.f32.xlu2 %v1117_v23 }
 0xe2c   : > { %v1119_v32 = vpop.xlane.xlu2 %1118 }
 0xe2d   : > { %v1120_v35 = vmul.f32 %v1119_v32, %v1899_v24 }
 0xe2f   : > { %v1121_v37 = vadd.f32 1e-05, %v1120_v35 }
 0xe31   : > { %1597 = vrsqrt.f32 %v1121_v37  ;;  %vm1128_vm15 = vweird.f32 %v1121_v37 }
 0xe37   : > { %v1598_v33 = vpop.eup %1597 }
 0xe38   : > { %v1123_v38 = vmul.f32 %v1598_v33, %v1121_v37  ;;  %vm1129_vm14 = vweird.f32 %v1598_v33 }
 0xe39   : > { %vm1130_vm0 = vmor %vm1128_vm15, %vm1129_vm14 }
 0xe3a   : > { %v1124_v39 = vmul.f32 %v1598_v33, %v1123_v38 }
 0xe3c   : > { %v1125_v40 = vmul.f32 0.5, %v1124_v39 }
 0xe3e   : > { %v1126_v41 = vsub.f32 1.5, %v1125_v40 }
 0xe40   : > { %v1127_v42 = vmul.f32 %v1598_v33, %v1126_v41  ;;  %v1237_v41 = vld [vmem:[%s2112_s5 + $0x20] sm:$0x7] }
 0xe42   : > { %v1131_v44 = vsel %vm1130_vm0, %v1598_v33, %v1127_v42 }
 0xe43   : > { %v1132_v46 = vmul.f32 %v1131_v44, %v1115_v21 }
 0xe45   : > { %v1134_v47 = vmul.f32 %v1133_v43, %v1132_v46 }
 0xe47   : > { %v1136_v48 = vadd.f32 %v1135_v45, %v1134_v47 }
 0xe49   : > { %v1137_v49 = vpack.c.bf16 %v1136_v48, %v1136_v48 }
 0xe4b   : > { %1467 = vmatmul.msk.bf16.vlgmr.msrb.gmra.mxu0 %vm326_vm1, %v1137_v49 }
 0xec8   : > { %v1159_v53 = vpop.f32.mrf.mxu0 }
 0xec9   : > { %v1160_v54 = vadd.f32 %v1159_v53, %v1138_v52 }
 0xecb   : > { %v1163_v55 = vmax.f32 %v1160_v54, 0.0 }
 0xecd   : > { %v1164_v56 = vpack.c.bf16 %v1163_v55, %v1163_v55 }
 0xecf   : > { %1484 = vmatmul.msk.bf16.vlgmr.msra.gmra.mxu1 %vm725_vm10, %v1164_v56 }
 0xed0   : > { %v1161_v57 = vpop.f32.mrf.mxu0 }
 0xf4c   : > { %v1202_v59 = vpop.f32.mrf.mxu1 }
 0xf4d   : > { %v1203_v60 = vadd.f32 %v1202_v59, %v1165_v58 }
 0xf4f   : > { %v1206_v61 = vadd.f32 %v1203_v60, %v1136_v48  ;;  %v1269_v48 = vrot.slane %v1237_v41, 2 }
 0xf51   : > { %v1207_v62 = vsel %vm326_vm1, %v1206_v61, 0.0 }
 0xf52   : > { %1208 = vadd.xlane.f32.xlu0 %v1207_v62 }
 0xf54   : > { %v1204_v63 = vpop.f32.mrf.mxu1 }
 0xfc5   : > { %v1209_v0 = vpop.xlane.xlu0 %1208 }
 0xfc6   : > { %v1210_v1 = vmul.f32 %v1209_v0, %v1899_v24 }
 0xfc8   : > { %v1211_v2 = vsub.f32 %v1206_v61, %v1210_v1 }
 0xfca   : > { %v1212_v3 = vmul.f32 %v1211_v2, %v1211_v2 }
 0xfcc   : > { %v1213_v4 = vsel %vm326_vm1, %v1212_v3, 0.0 }
 0xfcd   : > { %1214 = vadd.xlane.f32.xlu0 %v1213_v4 }
0x1040   : > { %v1215_v5 = vpop.xlane.xlu0 %1214 }
0x1041   : > { %v1216_v6 = vmul.f32 %v1215_v5, %v1899_v24 }
0x1043   : > { %v1217_v7 = vadd.f32 1e-05, %v1216_v6 }
0x1045   : > { %1599 = vrsqrt.f32 %v1217_v7  ;;  %vm1224_vm3 = vweird.f32 %v1217_v7 }
0x104b   : > { %v1600_v8 = vpop.eup %1599 }
0x104c   : > { %v1219_v9 = vmul.f32 %v1600_v8, %v1217_v7  ;;  %vm1225_vm2 = vweird.f32 %v1600_v8 }
0x104d   : > { %vm1226_vm4 = vmor %vm1224_vm3, %vm1225_vm2 }
0x104e   : > { %v1220_v10 = vmul.f32 %v1600_v8, %v1219_v9 }
0x1050   : > { %v1221_v11 = vmul.f32 0.5, %v1220_v10 }
0x1052   : > { %v1222_v12 = vsub.f32 1.5, %v1221_v11 }
0x1054   : > { %v1223_v13 = vmul.f32 %v1600_v8, %v1222_v12 }
0x1056   : > { %v1227_v15 = vsel %vm1226_vm4, %v1600_v8, %v1223_v13 }
0x1057   : > { %v1228_v16 = vmul.f32 %v1227_v15, %v1211_v2 }
0x1059   : > { %v1230_v18 = vmul.f32 %v1229_v14, %v1228_v16 }
0x105b   : > { %v1232_v19 = vadd.f32 %v1231_v17, %v1230_v18 }
0x105d   : > { %v1239_v20 = vsel %vm1238_vm5, %v1232_v19, 0.0 }
0x105e   : > { %1240 = vadd.xlane.f32.xlu0 %v1239_v20 }
0x10d1   : > { %v1241_v21 = vpop.xlane.xlu0 %1240 }
0x10d2   : > { %v1242_v22 = vmul.f32 %v1241_v21, %v1899_v24 }
0x10d4   : > { %v1243_v23 = vsub.f32 %v1232_v19, %v1242_v22 }
0x10d6   : > { %v1244_v25 = vmul.f32 %v1243_v23, %v1243_v23 }
0x10d8   : > { %v1245_v30 = vsel %vm1238_vm5, %v1244_v25, 0.0 }
0x10d9   : > { %1246 = vadd.xlane.f32.xlu1 %v1245_v30 }
0x114c   : > { %v1247_v32 = vpop.xlane.xlu1 %1246 }
0x114d   : > { %v1248_v35 = vmul.f32 %v1247_v32, %v1899_v24  ;;  %v1263_v24 = vrot.slane %v1237_v41, 1 }
0x114f   : > { %v1249_v36 = vadd.f32 1e-05, %v1248_v35 }
0x1151   : > { %1601 = vrsqrt.f32 %v1249_v36  ;;  %vm1256_vm7 = vweird.f32 %v1249_v36 }
0x1157   : > { %v1602_v37 = vpop.eup %1601 }
0x1158   : > { %v1251_v33 = vmul.f32 %v1602_v37, %v1249_v36  ;;  %vm1257_vm6 = vweird.f32 %v1602_v37 }
0x1159   : > { %vm1258_vm8 = vmor %vm1256_vm7, %vm1257_vm6 }
0x115a   : > { %v1252_v38 = vmul.f32 %v1602_v37, %v1251_v33 }
0x115c   : > { %v1253_v39 = vmul.f32 0.5, %v1252_v38 }
0x115e   : > { %v1254_v40 = vsub.f32 1.5, %v1253_v39 }
0x1160   : > { %v1255_v42 = vmul.f32 %v1602_v37, %v1254_v40 }
0x1162   : > { %v1259_v43 = vsel %vm1258_vm8, %v1602_v37, %v1255_v42 }
0x1163   : > { %v1260_v44 = vmul.f32 %v1259_v43, %v1243_v23 }
0x1165   : > { %v1261_v45 = vmul.f32 %v1260_v44, %v1237_v41 }
0x1167   : > { %v1265_v46 = vadd.f32 %v1263_v24, %v1261_v45 }
0x1169   : > { %v1266_v47 = vpack.c.bf16 %v1265_v46, %v1265_v46 }
0x116b   : > { %1485 = vmatmul.msk.bf16.vlgmr.msra.gmra.mxu2 %vm326_vm1, %v1266_v47 }
0x11ee   : > { %v1283_v49 = vpop.f32.mrf.mxu2 }
0x11ef   : > { %v1284_v50 = vadd.f32 %v1283_v49, %v1269_v48 }
0x11f1   : > { %1288 = vst.msk [vmem:[%s241_s29] sm:$0x1] %vm1287_vm9, %v1284_v50 }
0x11f2   : > { %1630 = shalt.err (!%p1627_p3)
}
0x11f3   : > { %1508 = dma.vmem_to_hbm [thread:$0]  (%p1751_p5), %s1301_s9, 16, %s1303_s10, %s1290_s11  }
0x11f6   : > { %v1285_v51 = vpop.f32.mrf.mxu2 }
0x11f7 PF: > { %p1514_p4 = scmp.ge.s32.totalorder %s1665_s24, 2  ;;  %s1314_s15 = sand.u32 1, %s1653_s21  }
0x11f8   : > { %s1315_s16 = scalar_lea.sflag [#allocation3], %s1314_s15 }
0x11f9   : > { %p1511_p7 = pnand %p1514_p4, %p1755_p6 }
0x11fb   : > { %p1512_p8 = pneg %p1511_p7 }
0x11fd   : > { %1648 = dma.done.wait (%p1512_p8), %s1315_s16, 16  }
0x11fe   : > { %1650 = vsyncadd (%p1512_p8), %s1315_s16, 4294967280  ;;  %p16_p9 = scmp.ge.s32.totalorder %s1738_s27, 4   ;;  %s2122_s21 = smov %s1657_s22 }
0x11ff   : > { %s2123_s22 = smov %s1661_s23  ;;  %s2124_s23 = smov %s1749_s30 }
0x1200   : > { %s2125_s24 = smov %s1738_s27  ;;  %18 = sbr.rel (!%p16_p9) target bundleno = 3 (0x3), region = 82 }
0x1205   :  { %1320 = vsyncpa [#allocation3], 1 }
0x1206   :  { %1322 = vsyncpa [#allocation3 + $0x1], 1 }

</bundles_post_ra>
